<compile_context>
chip_gen: v5e
topology: v5e:2x2
jax: 0.10.0
libtpu: 0.0.40
codegen_flags: <defaults>
</compile_context>

<pallas_src>
import math

import jax
import jax.numpy as jnp
from jax import lax
from jax.experimental import pallas as pl
from jax.experimental.pallas import tpu as pltpu

CHAIN_STEPS = 100
T_EMB = 32       # sinusoidal time-embedding dimension
HID = 128        # hidden channel width of the diffusion head (lane-friendly)
P2_GAMMA = 1.0   # p2 weighting gamma
P2_K = 1.0       # p2 weighting k

MAX_LANE_TILE = 8192          # max spatial lanes per block (multiple of 128)
MAX_BATCH_FOLD = 8            # max batch items folded into one block
TARGET_BLOCK_BYTES = 1 << 20  # ~1 MiB of x per block before folding stops
VMEM_CAP_BYTES = 28 << 20     # v7x-safe working-set ceiling (64 MiB physical)


# --------------------------------------------------------------------------
# Noise-variance schedule + derived buffers (plain JAX glue; matches
# prepare_forward_equations / prepare_output_weight with a linear schedule).
# --------------------------------------------------------------------------
def make_schedule(chain_steps, beta_start=1e-4, beta_end=2e-2):
    betas = jnp.linspace(beta_start, beta_end, chain_steps, dtype=jnp.float32)
    alphas = 1.0 - betas
    alphas_hat = jnp.cumprod(alphas)
    return dict(
        betas=betas,
        alphas=alphas,
        alphas_hat=alphas_hat,
        sqrt_alphas_hat=jnp.sqrt(alphas_hat),
        sqrt_one_minus_alphas_hat=jnp.sqrt(1.0 - alphas_hat),
        p2_weighting=(P2_K + alphas_hat / (1.0 - alphas_hat)) ** (-P2_GAMMA),
    )


# --------------------------------------------------------------------------
# Fused kernel: forward noising + pointwise-conv diffusion head.
# Block per grid step (batch group bg, spatial tile r):
#   x, eps : (nb, C, thw) f32 -> noised = a*x + c*eps        (VPU, f32)
#   conv1  : w1 (HID, C) f32  -> VPU unrolled FMAs over C (MXU would run at
#                                ~C/256 utilization for tiny C); +temb; SiLU
#   conv2  : w2 (C, HID) bf16 -> MXU, K = HID = 128, f32 accumulation
# --------------------------------------------------------------------------
def _make_kernel(nb, channels):
    small_c = channels <= 16

    def kernel(coef_a_ref, coef_b_ref, x_ref, eps_ref, temb_ref,
               w1_ref, w2_ref, bc2_ref, out_ref):
        bg = pl.program_id(0)

        # loop-invariant loads hoisted out of the per-batch-item loop
        bc2 = bc2_ref[...]                       # (C, 1) f32
        w2 = w2_ref[...]                         # (C, HID) bf16
        if small_c:
            w1_cols = [w1_ref[:, ch:ch + 1] for ch in range(channels)]  # (HID,1) f32
        else:
            w1_bf16 = w1_ref[...].astype(jnp.bfloat16)

        def item(i):
            b = bg * nb + i
            a = coef_a_ref[b]
            c = coef_b_ref[b]

            # forward noising q(x_t | x_0) -- f32 on the VPU (sublane-sparse, no pack)
            noised = a * x_ref[i] + c * eps_ref[i]            # (C, thw) f32

            if small_c:
                # layer-1 pointwise conv as C broadcast FMAs on the VPU
                h = w1_cols[0] * noised[0:1, :]               # (HID, thw) f32
                for ch in range(1, channels):
                    h = h + w1_cols[ch] * noised[ch:ch + 1, :]
            else:
                # large C: keep the MXU (K is reasonably shaped)
                h = jnp.dot(w1_bf16, noised.astype(jnp.bfloat16),
                            preferred_element_type=jnp.float32)

            h = h + temb_ref[i]                               # + time proj (+ bc1), (HID,1) bcast
            h = h * jax.nn.sigmoid(h)                         # SiLU (EUP + VPU), f32

            # layer-2 pointwise conv on the MXU; only the dense h is packed to bf16
            o = jnp.dot(w2, h.astype(jnp.bfloat16),
                        preferred_element_type=jnp.float32)   # (C, thw) f32
            out_ref[i] = (o + bc2).astype(out_ref.dtype)

        if nb == 1:
            item(0)
        else:
            # fori_loop (not a static Python loop) bounds the live range of the
            # (HID, thw) intermediates across folded batch items.
            def body(i, carry):
                item(i)
                return carry
            lax.fori_loop(0, nb, body, 0)

    return kernel


def _round_up(x, m):
    return ((x + m - 1) // m) * m


def _choose_spatial_tile(hw, channels):
    """Pad HW to a multiple of 128 and pick a large lane-dense spatial tile."""
    # keep a single (C, thw) f32 block around ~<= 2 MiB so batch-folding / VMEM stay sane
    per_c_cap = max(512, ((1 << 21) // (channels * 4)) // 128 * 128)
    max_tile = min(MAX_LANE_TILE, per_c_cap)
    hwp = _round_up(hw, 128)
    if hwp <= max_tile:
        return hwp, hwp
    for t in range(max_tile, 127, -128):
        if hwp % t == 0:
            return hwp, t
    hwp = _round_up(hwp, max_tile)
    return hwp, max_tile


def _choose_batch_fold(batch, channels, thw, n_spatial_tiles):
    """Fold batch items per block until ~TARGET_BLOCK_BYTES, keep grid >= 2."""
    block_bytes = channels * thw * 4
    nb = max(1, min(batch, MAX_BATCH_FOLD, TARGET_BLOCK_BYTES // max(block_bytes, 1)))
    while batch % nb:
        nb -= 1
    # keep at least two grid steps so v7x megacore has work for both TensorCores
    while nb > 1 and (batch // nb) * n_spatial_tiles < 2:
        nb -= 1
        while batch % nb:
            nb -= 1
    return nb


def _vmem_limit_bytes(nb, channels, thw):
    sample_block = nb * channels * thw * 4
    io = 3 * 2 * sample_block                          # x, eps, out double-buffered
    inter = HID * thw * (4 + 2) + channels * thw * 4   # h f32 + h bf16 + conv2 out
    weights = HID * channels * 4 + channels * HID * 2 + nb * HID * 4 + channels * 4
    est = int((io + inter + weights) * 1.5) + (4 << 20)
    return int(max(16 << 20, min(est, VMEM_CAP_BYTES + (8 << 20))))


def fused_forward_head(x_cm, eps_cm, coef_a, coef_b, temb, w1, w2_bf16, bc2):
    """x_cm, eps_cm: (B, C, HW) f32. Returns predicted noise (B, C, HW) f32."""
    B, C, HW = x_cm.shape
    HWp, thw = _choose_spatial_tile(HW, C)
    if HWp != HW:
        pad = ((0, 0), (0, 0), (0, HWp - HW))
        x_cm = jnp.pad(x_cm, pad)
        eps_cm = jnp.pad(eps_cm, pad)

    n_sp = HWp // thw
    nb = _choose_batch_fold(B, C, thw, n_sp)
    grid = (B // nb, n_sp)

    sample_spec = pl.BlockSpec((nb, C, thw), lambda bg, r: (bg, 0, r))
    smem_spec = pl.BlockSpec(memory_space=pltpu.MemorySpace.SMEM)

    out = pl.pallas_call(
        _make_kernel(nb, C),
        out_shape=jax.ShapeDtypeStruct((B, C, HWp), jnp.float32),
        grid=grid,
        in_specs=[
            smem_spec,                                              # coef_a (B,) f32
            smem_spec,                                              # coef_b (B,) f32
            sample_spec,                                            # x
            sample_spec,                                            # eps
            pl.BlockSpec((nb, HID, 1), lambda bg, r: (bg, 0, 0)),   # temb (+ bc1)
            pl.BlockSpec((HID, C), lambda bg, r: (0, 0)),           # w1 (f32, VPU path)
            pl.BlockSpec((C, HID), lambda bg, r: (0, 0)),           # w2 (bf16, MXU)
            pl.BlockSpec((C, 1), lambda bg, r: (0, 0)),             # bc2
        ],
        out_specs=sample_spec,
        compiler_params=pltpu.CompilerParams(
            dimension_semantics=("parallel", "parallel"),
            vmem_limit_bytes=_vmem_limit_bytes(nb, C, thw),
        ),
    )(coef_a, coef_b, x_cm, eps_cm, temb, w1, w2_bf16, bc2)

    if HWp != HW:
        out = out[:, :, :HW]
    return out


# --------------------------------------------------------------------------
# Glue: sinusoidal time embedding + hoisted time-projection MLP, params, forward.
# --------------------------------------------------------------------------
def sinusoidal_time_embedding(steps, dim):
    # TODO(synk): reference uses a config-defined embedding; (half - 1) denominator
    # assumed here -- verify against the real GeneralizedDiffusionHead embedding.
    half = dim // 2
    freqs = jnp.exp(-math.log(10000.0) * jnp.arange(half, dtype=jnp.float32) / (half - 1))
    args = steps.astype(jnp.float32)[:, None] * freqs[None, :]
    return jnp.concatenate([jnp.sin(args), jnp.cos(args)], axis=-1)  # (B, dim)


def time_projection(params, time_steps_id):
    """Batched time-projection MLP, hoisted out of the Pallas kernel."""
    emb = sinusoidal_time_embedding(time_steps_id, T_EMB)             # (B, T_EMB)
    t = emb @ params["wt1"] + params["bt1"]
    t = t * jax.nn.sigmoid(t)                                         # SiLU
    t = t @ params["wt2"] + params["bt2"]
    # fold the head's first conv bias here so the kernel needs one fewer input
    return t + params["bc1"]                                          # (B, HID)


def init_head_params(channels, key):
    ks = jax.random.split(key, 4)
    s = lambda fan_in: 1.0 / math.sqrt(fan_in)
    return dict(
        wt1=jax.random.normal(ks[0], (T_EMB, HID), jnp.float32) * s(T_EMB),
        bt1=jnp.zeros((HID,), jnp.float32),
        wt2=jax.random.normal(ks[1], (HID, HID), jnp.float32) * s(HID),
        bt2=jnp.zeros((HID,), jnp.float32),
        # pointwise-conv head weights stored channels-major to match the
        # (C, H*W) kernel layout: h = w1 @ x, out = w2 @ h
        w1=jax.random.normal(ks[2], (HID, channels), jnp.float32) * s(channels),
        bc1=jnp.zeros((HID,), jnp.float32),
        w2=jax.random.normal(ks[3], (channels, HID), jnp.float32) * s(HID),
        bc2=jnp.zeros((channels,), jnp.float32),
    )


def generalized_diffusion_forward(params, schedule, x_samples, x_noises, time_steps_id):
    """x_samples / x_noises: NCHW float32. Returns dict (BaseDiffusionOutput)."""
    B, C, H, W = x_samples.shape
    HW = H * W

    # NCHW is already channels-major: spatial (H*W) goes straight to the lane dim.
    x_cm = x_samples.reshape(B, C, HW).astype(jnp.float32)
    eps_cm = x_noises.reshape(B, C, HW).astype(jnp.float32)

    # per-batch scalar schedule coefficients (extract_items)
    coef_a = schedule["sqrt_alphas_hat"][time_steps_id]
    coef_b = schedule["sqrt_one_minus_alphas_hat"][time_steps_id]

    # hoisted time-projection MLP (tiny B x T_EMB x HID matmuls), bc1 folded in
    temb = time_projection(params, time_steps_id).reshape(B, HID, 1)

    w1_f32 = params["w1"].astype(jnp.float32)        # stays f32 (VPU path)
    w2_bf16 = params["w2"].astype(jnp.bfloat16)      # MXU path
    bc2 = params["bc2"].reshape(C, 1)

    # fused: forward noising + diffusion-head prediction (prediction_type == 'noise')
    preds_cm = fused_forward_head(x_cm, eps_cm, coef_a, coef_b, temb,
                                  w1_f32, w2_bf16, bc2)
    preds_nchw = preds_cm.reshape(B, C, H, W)

    # p2 output weights, broadcast to prediction ndim (extract_items)
    predictions_weight = schedule["p2_weighting"][time_steps_id].reshape(B, 1, 1, 1)

    # create_diffusion_targets('noise', ...)
    targets = x_noises

    # TODO(synk): reverse-sampling chain (reverse_sample_via_ddpm / diffusion_reverse_sampling)
    # is inference-only control flow over T steps and is not part of forward(); not implemented.
    return dict(
        prediction_type="noise",
        predictions=preds_nchw,
        diffusion_targets=targets,
        predictions_weight=predictions_weight,
        time_steps=time_steps_id,
    )


if __name__ == "__main__":
    key = jax.random.PRNGKey(0)
    k_x, k_eps, k_t, k_params = jax.random.split(key, 4)

    B, C, H, W = 2, 4, 16, 16
    x_samples = jax.random.normal(k_x, (B, C, H, W), jnp.float32)
    x_noises = jax.random.normal(k_eps, (B, C, H, W), jnp.float32)
    time_steps_id = jax.random.randint(k_t, (B,), 0, CHAIN_STEPS)

    schedule = make_schedule(CHAIN_STEPS)
    params = init_head_params(C, k_params)

    out = generalized_diffusion_forward(params, schedule, x_samples, x_noises, time_steps_id)
    jax.block_until_ready(out["predictions"])
    jax.block_until_ready(out["predictions_weight"])

    assert out["predictions"].shape == (B, C, H, W)
    assert out["diffusion_targets"].shape == (B, C, H, W)
    assert out["predictions_weight"].shape == (B, 1, 1, 1)
    assert out["time_steps"].shape == (B,)
    print("KERNEL_OK")
</pallas_src>

<mosaic_0001>
module attributes {stable_mosaic.version = 11 : i64} {
  func.func @kernel(%arg0: i32, %arg1: i32, %arg2: memref<2xf32, #tpu.memory_space<smem>>, %arg3: memref<2xf32, #tpu.memory_space<smem>>, %arg4: memref<1x4x256xf32, #tpu.memory_space<vmem>>, %arg5: memref<1x4x256xf32, #tpu.memory_space<vmem>>, %arg6: memref<1x128x1xf32, #tpu.memory_space<vmem>>, %arg7: memref<128x4xf32, #tpu.memory_space<vmem>>, %arg8: memref<4x128xbf16, #tpu.memory_space<vmem>>, %arg9: memref<4x1xf32, #tpu.memory_space<vmem>>, %arg10: memref<1x4x256xf32, #tpu.memory_space<vmem>>) attributes {dimension_semantics = [#tpu.dimension_semantics<parallel>, #tpu.dimension_semantics<parallel>], iteration_bounds = array<i64: 2, 1>, scalar_prefetch = 0 : i64, scratch_operands = 0 : i64, tpu.core_type = #tpu.core_type<tc>, window_params = [{transform_indices = @transform_0, window_bounds = array<i64: 2>}, {transform_indices = @transform_1, window_bounds = array<i64: 2>}, {transform_indices = @transform_2, window_bounds = array<i64: 1, 4, 256>}, {transform_indices = @transform_3, window_bounds = array<i64: 1, 4, 256>}, {transform_indices = @transform_4, window_bounds = array<i64: 1, 128, 1>}, {pipeline_mode = #tpu.pipeline_mode<synchronous>, transform_indices = @transform_5, window_bounds = array<i64: 128, 4>}, {pipeline_mode = #tpu.pipeline_mode<synchronous>, transform_indices = @transform_6, window_bounds = array<i64: 4, 128>}, {pipeline_mode = #tpu.pipeline_mode<synchronous>, transform_indices = @transform_7, window_bounds = array<i64: 4, 1>}, {transform_indices = @transform_8, window_bounds = array<i64: 1, 4, 256>}]} {
    %c0 = arith.constant 0 : index
    %c0_0 = arith.constant 0 : index
    %0 = vector.load %arg9[%c0, %c0_0] : memref<4x1xf32, #tpu.memory_space<vmem>>, vector<4x1xf32>
    %c0_1 = arith.constant 0 : index
    %c0_2 = arith.constant 0 : index
    %1 = vector.load %arg8[%c0_1, %c0_2] : memref<4x128xbf16, #tpu.memory_space<vmem>>, vector<4x128xbf16>
    %c0_3 = arith.constant 0 : index
    %c0_4 = arith.constant 0 : index
    %2 = vector.load %arg7[%c0_3, %c0_4] : memref<128x4xf32, #tpu.memory_space<vmem>>, vector<128x1xf32>
    %c0_5 = arith.constant 0 : index
    %c1 = arith.constant 1 : index
    %3 = vector.load %arg7[%c0_5, %c1] : memref<128x4xf32, #tpu.memory_space<vmem>>, vector<128x1xf32>
    %c0_6 = arith.constant 0 : index
    %c2 = arith.constant 2 : index
    %4 = vector.load %arg7[%c0_6, %c2] : memref<128x4xf32, #tpu.memory_space<vmem>>, vector<128x1xf32>
    %c0_7 = arith.constant 0 : index
    %c3 = arith.constant 3 : index
    %5 = vector.load %arg7[%c0_7, %c3] : memref<128x4xf32, #tpu.memory_space<vmem>>, vector<128x1xf32>
    %c1_i32 = arith.constant 1 : i32
    %6 = arith.muli %arg0, %c1_i32 : i32
    %c0_i32 = arith.constant 0 : i32
    %7 = arith.addi %6, %c0_i32 : i32
    %8 = arith.index_cast %7 : i32 to index
    %9 = memref.load %arg2[%8] : memref<2xf32, #tpu.memory_space<smem>>
    %10 = arith.index_cast %7 : i32 to index
    %11 = memref.load %arg3[%10] : memref<2xf32, #tpu.memory_space<smem>>
    %c0_8 = arith.constant 0 : index
    %c0_9 = arith.constant 0 : index
    %c0_10 = arith.constant 0 : index
    %12 = vector.load %arg4[%c0_8, %c0_9, %c0_10] : memref<1x4x256xf32, #tpu.memory_space<vmem>>, vector<1x4x256xf32>
    %13 = vector.shape_cast %12 : vector<1x4x256xf32> to vector<4x256xf32>
    %14 = vector.broadcast %9 : f32 to vector<4x256xf32>
    %15 = arith.mulf %14, %13 : vector<4x256xf32>
    %c0_11 = arith.constant 0 : index
    %c0_12 = arith.constant 0 : index
    %c0_13 = arith.constant 0 : index
    %16 = vector.load %arg5[%c0_11, %c0_12, %c0_13] : memref<1x4x256xf32, #tpu.memory_space<vmem>>, vector<1x4x256xf32>
    %17 = vector.shape_cast %16 : vector<1x4x256xf32> to vector<4x256xf32>
    %18 = vector.broadcast %11 : f32 to vector<4x256xf32>
    %19 = arith.mulf %18, %17 : vector<4x256xf32>
    %20 = arith.addf %15, %19 : vector<4x256xf32>
    %21 = vector.extract_strided_slice %20 {offsets = [0, 0], sizes = [1, 256], strides = [1, 1]} : vector<4x256xf32> to vector<1x256xf32>
    %22 = vector.broadcast %2 : vector<128x1xf32> to vector<128x256xf32>
    %23 = vector.broadcast %21 : vector<1x256xf32> to vector<128x256xf32>
    %24 = arith.mulf %22, %23 : vector<128x256xf32>
    %25 = vector.extract_strided_slice %20 {offsets = [1, 0], sizes = [1, 256], strides = [1, 1]} : vector<4x256xf32> to vector<1x256xf32>
    %26 = vector.broadcast %3 : vector<128x1xf32> to vector<128x256xf32>
    %27 = vector.broadcast %25 : vector<1x256xf32> to vector<128x256xf32>
    %28 = arith.mulf %26, %27 : vector<128x256xf32>
    %29 = arith.addf %24, %28 : vector<128x256xf32>
    %30 = vector.extract_strided_slice %20 {offsets = [2, 0], sizes = [1, 256], strides = [1, 1]} : vector<4x256xf32> to vector<1x256xf32>
    %31 = vector.broadcast %4 : vector<128x1xf32> to vector<128x256xf32>
    %32 = vector.broadcast %30 : vector<1x256xf32> to vector<128x256xf32>
    %33 = arith.mulf %31, %32 : vector<128x256xf32>
    %34 = arith.addf %29, %33 : vector<128x256xf32>
    %35 = vector.extract_strided_slice %20 {offsets = [3, 0], sizes = [1, 256], strides = [1, 1]} : vector<4x256xf32> to vector<1x256xf32>
    %36 = vector.broadcast %5 : vector<128x1xf32> to vector<128x256xf32>
    %37 = vector.broadcast %35 : vector<1x256xf32> to vector<128x256xf32>
    %38 = arith.mulf %36, %37 : vector<128x256xf32>
    %39 = arith.addf %34, %38 : vector<128x256xf32>
    %c0_14 = arith.constant 0 : index
    %c0_15 = arith.constant 0 : index
    %c0_16 = arith.constant 0 : index
    %40 = vector.load %arg6[%c0_14, %c0_15, %c0_16] : memref<1x128x1xf32, #tpu.memory_space<vmem>>, vector<1x128x1xf32>
    %41 = vector.shape_cast %40 : vector<1x128x1xf32> to vector<128x1xf32>
    %42 = vector.broadcast %41 : vector<128x1xf32> to vector<128x256xf32>
    %43 = arith.addf %39, %42 : vector<128x256xf32>
    %44 = arith.negf %43 : vector<128x256xf32>
    %45 = math.exp %44 : vector<128x256xf32>
    %cst = arith.constant 1.000000e+00 : f32
    %46 = vector.broadcast %cst : f32 to vector<128x256xf32>
    %47 = arith.addf %46, %45 : vector<128x256xf32>
    %48 = arith.divf %46, %47 : vector<128x256xf32>
    %49 = arith.mulf %43, %48 : vector<128x256xf32>
    %50 = arith.truncf %49 : vector<128x256xf32> to vector<128x256xbf16>
    %cst_17 = arith.constant dense<0.000000e+00> : vector<4x256xf32>
    %51 = tpu.matmul %1, %50, %cst_17 {dimension_numbers = #tpu.dot_dimension_numbers<[1], [0], [0], [1], [0, 0, 1, 1], [], []>} : vector<4x128xbf16>, vector<128x256xbf16>, vector<4x256xf32> -> vector<4x256xf32>
    %52 = vector.broadcast %0 : vector<4x1xf32> to vector<4x256xf32>
    %53 = arith.addf %51, %52 : vector<4x256xf32>
    %c0_18 = arith.constant 0 : index
    %c0_19 = arith.constant 0 : index
    %c0_20 = arith.constant 0 : index
    %54 = vector.load %arg10[%c0_18, %c0_19, %c0_20] : memref<1x4x256xf32, #tpu.memory_space<vmem>>, vector<1x4x256xf32>
    %55 = vector.shape_cast %54 : vector<1x4x256xf32> to vector<4x256xf32>
    %56 = vector.shape_cast %53 : vector<4x256xf32> to vector<1x4x256xf32>
    tpu.vector_store %arg10[%c0_18, %c0_19, %c0_20], %56 {strides = array<i32>} : memref<1x4x256xf32, #tpu.memory_space<vmem>>, vector<1x4x256xf32>,
    return
  }
  func.func @transform_0(%arg0: i32, %arg1: i32) -> i32 {
    %c0_i32 = arith.constant 0 : i32
    %c0_i32_0 = arith.constant 0 : i32
    return %c0_i32 : i32
  }
  func.func @transform_1(%arg0: i32, %arg1: i32) -> i32 {
    %c0_i32 = arith.constant 0 : i32
    %c0_i32_0 = arith.constant 0 : i32
    return %c0_i32 : i32
  }
  func.func @transform_2(%arg0: i32, %arg1: i32) -> (i32, i32, i32) {
    %c0_i32 = arith.constant 0 : i32
    %c0_i32_0 = arith.constant 0 : i32
    return %arg0, %c0_i32, %arg1 : i32, i32, i32
  }
  func.func @transform_3(%arg0: i32, %arg1: i32) -> (i32, i32, i32) {
    %c0_i32 = arith.constant 0 : i32
    %c0_i32_0 = arith.constant 0 : i32
    return %arg0, %c0_i32, %arg1 : i32, i32, i32
  }
  func.func @transform_4(%arg0: i32, %arg1: i32) -> (i32, i32, i32) {
    %c0_i32 = arith.constant 0 : i32
    %c0_i32_0 = arith.constant 0 : i32
    %c0_i32_1 = arith.constant 0 : i32
    return %arg0, %c0_i32, %c0_i32_0 : i32, i32, i32
  }
  func.func @transform_5(%arg0: i32, %arg1: i32) -> (i32, i32) {
    %c0_i32 = arith.constant 0 : i32
    %c0_i32_0 = arith.constant 0 : i32
    %c0_i32_1 = arith.constant 0 : i32
    return %c0_i32, %c0_i32_0 : i32, i32
  }
  func.func @transform_6(%arg0: i32, %arg1: i32) -> (i32, i32) {
    %c0_i32 = arith.constant 0 : i32
    %c0_i32_0 = arith.constant 0 : i32
    %c0_i32_1 = arith.constant 0 : i32
    return %c0_i32, %c0_i32_0 : i32, i32
  }
  func.func @transform_7(%arg0: i32, %arg1: i32) -> (i32, i32) {
    %c0_i32 = arith.constant 0 : i32
    %c0_i32_0 = arith.constant 0 : i32
    %c0_i32_1 = arith.constant 0 : i32
    return %c0_i32, %c0_i32_0 : i32, i32
  }
  func.func @transform_8(%arg0: i32, %arg1: i32) -> (i32, i32, i32) {
    %c0_i32 = arith.constant 0 : i32
    %c0_i32_0 = arith.constant 0 : i32
    return %arg0, %c0_i32, %arg1 : i32, i32, i32
  }
}

</mosaic_0001>

<bundles_post_ra>
// kernel: tpu_custom_call.1
= control target key start
LH: loop header
LB: loop body
LE: loop exit
PB: predicated region body
PF: predicated region fallthrough
CT: control target
= control target key end

     0   :  { %13 = vsyncpa [#allocation4], 0  ;;  %s3888_s0 = inlined_call_operand.vmem [shape: f32[2], index: 0, kind: input, shape index: {}]   ;;  %s3889_s1 = inlined_call_operand.vmem [shape: f32[2], index: 1, kind: input, shape index: {}]   ;;  %s3890_s2 = inlined_call_operand.vmem [shape: f32[2,4,256], index: 2, kind: input, shape index: {}]   ;;  %s3891_s3 = inlined_call_operand.vmem [shape: f32[2,4,256], index: 3, kind: input, shape index: {}]   ;;  %s3892_s4 = inlined_call_operand.vmem [shape: f32[2,128,1], index: 4, kind: input, shape index: {}]   ;;  %s3893_s5 = inlined_call_operand.vmem [shape: f32[128,4], index: 5, kind: input, shape index: {}]   ;;  %s3894_s6 = inlined_call_operand.vmem [shape: bf16[4,128], index: 6, kind: input, shape index: {}]   ;;  %s3895_s7 = inlined_call_operand.vmem [shape: f32[4,1], index: 7, kind: input, shape index: {}]   ;;  %s3896_s8 = inlined_call_operand.hbm [shape: f32[2,4,256], index: 8, kind: output, shape index: {}]  }
   0x1   :  { %14 = vsyncpa [#allocation6], 0 }
   0x2   :  { %15 = vsyncpa [#allocation3], 0 }
   0x3   :  { %17 = vsyncpa [#allocation3 + $0x1], 0  ;;  %s2401_s27 = smov 0   ;;  %s2403_s28 = smov 0  }
   0x4   :  { %s2405_s29 = smov 0   ;;  %s2407_s30 = smov 0  }
   0x5   :  { %s2409_s9 = smov 0   ;;  %s2411_s10 = smov 0  }
   0x6 LB: > { %s1935_s11 = sadd.s32 4294967295, %s2348_s10   ;;  %s1936_s12 = sadd.s32 4294967294, %s2348_s10   ;;  %s2348_s10 = sphi %s2411_s10, %s23_s10   ;;  %s2344_s9 = sphi %s2409_s9, %s3998_s9   ;;  %s2340_s30 = sphi %s2407_s30, %s3997_s30   ;;  %s2336_s29 = sphi %s2405_s29, %s3996_s29   ;;  %s2332_s28 = sphi %s2403_s28, %s3995_s28   ;;  %s2328_s27 = sphi %s2401_s27, %s3994_s27  }
   0x7   : > { %s35_s13 = sadd.s32 1, %s2344_s9  ;;  %s231_s14 = sadd.s32 1, %s2336_s29 }
   0x8   : > { %p37_p0 = scmp.ge.s32.totalorder %s35_s13, 2  ;;  %p241_p1 = scmp.ne.s32.totalorder %s2336_s29, %s2332_s28 }
   0x9   : > { %p242_p2 = scmp.eq.s32.totalorder %s1935_s11, 1  ;;  %p247_p3 = scmp.ne.s32.totalorder %s2332_s28, %s2328_s27 }
   0xa   : > { %s4000_s13 = smov (%p37_p0, %s35_s13), 0  ;;  %p248_p5 = scmp.eq.s32.totalorder %s1936_s12, 1 }
   0xb   : > { %p2441_p4 = por %p242_p2, %p241_p1  ;;  %s226_s16 = ssub.s32 %s2344_s9, %s4000_s13 }
   0xc   : > { %p1937_p6 = scmp.ge.s32.totalorder %s2348_s10, 1  ;;  %p229_p7 = scmp.eq.s32.totalorder %s226_s16, 0 }
   0xd   : > { %p2448_p8 = por %p248_p5, %p247_p3  ;;  %p255_p9 = scmp.lt.s32.totalorder %s2348_s10, 3 }
   0xe   : > { %s2454_s18 = scalar_select %p229_p7, %s2336_s29, %s231_s14  }
   0xf   : > { %p256_p10 = pnand %p1937_p6, %p255_p9  ;;  %p2456_p11 = scmp.eq.s32.totalorder %s1935_s11, 0 }
  0x10   : > { %s267_s22 = sshll.u32 %s3888_s0, 4  ;;  %s277_s25 = sshll.u32 %s3889_s1, 4  ;;  %s268_s22 = int_to_ptr.vmem [resolvable:$true] %s267_s22  ;;  %s278_s25 = int_to_ptr.vmem [resolvable:$true] %s277_s25 }
  0x11   : > { %p2002_p12 = pneg %p256_p10  ;;  %s2350_s26 = smov [#allocation2]  }
  0x12   : > { %s2351_s11 = smov [#allocation5]   ;;  %333 = sbr.rel (%p256_p10) target bundleno = 599 (0x257), region = 52 }
  0x13   : > { %p2003_p13 = pnand %p2456_p11, %p2002_p12 }
  0x15   : > { %2005 = dma.vmem_to_smem (!%p2003_p13), %s268_s22, 16, %s2350_s26, [#allocation4]  }
  0x16   : > { %2008 = dma.vmem_to_smem (!%p2003_p13), %s278_s25, 16, %s2351_s11, [#allocation6]  }
  0x17   : > { %2315 = dma.done.wait (%p2456_p11), [#allocation4], 16  }
  0x18   : > { %2317 = vsyncadd (%p2456_p11), [#allocation4], 4294967280 }
  0x19   : > { %2319 = dma.done.wait (%p2456_p11), [#allocation6], 16  }
  0x1a   : > { %2321 = vsyncadd (%p2456_p11), [#allocation6], 4294967280 }
  0x1b   : > { %345 = sfence }
  0x1c   : > { %v2479_v0 = vld [vmem:[%s3893_s5 + $0x20] sm:$0xff]  ;;  %v2484_v1 = vld [vmem:[%s3893_s5 + $0x10] sm:$0xff]  ;;  %v2352_v2 = vmov 1   ;;  %v2353_v3 = vmov 0   ;;  %v425_v4 = vld [vmem:[%s3893_s5 + $0x28] sm:$0xff]  ;;  %v2354_v13 = vmov 2  }
  0x1d   : > { %2076 = vset.pattern.permute.xlu0 %v2352_v2  ;;  %2073 = vset.pattern.permute.xlu2 %v2353_v3  ;;  %v2497_v5 = vld [vmem:[%s3893_s5 + $0x38] sm:$0xff]  ;;  %v2509_v7 = vld [vmem:[%s3893_s5 + $0x40] sm:$0xff]  ;;  %v2514_v8 = vld [vmem:[%s3893_s5 + $0x50] sm:$0xff]  ;;  %v2355_v17 = vmov 3   ;;  %p393_p0 = scmp.lt.s32.totalorder %s2340_s30, 1  ;;  %s436_s25 = sld [smem:[#allocation2 + %s2340_s30]] }
  0x1e   : > { %2072 = vset.pattern.permute.xlu1 %v2353_v3  ;;  %467 = vperm.xlu2 %2073, %v2479_v0   ;;  %v2502_v6 = vld [vmem:[%s3893_s5 + $0x18] sm:$0xff]  ;;  %v2527_v10 = vld [vmem:[%s3893_s5 + $0x68] sm:$0xff]  ;;  %v2535_v11 = vld [vmem:[%s3893_s5 + $0x70] sm:$0xff]  ;;  %s437_s26 = sld [smem:[#allocation5 + %s2340_s30]]  ;;  %s1991_s19 = sshll.u32 %s2340_s30, 3 }
  0x1f   : > { %573 = vperm.xlu0 %2076, %v2484_v1   ;;  %457 = vperm.xlu1 %2072, %v2484_v1   ;;  %v2522_v9 = vld [vmem:[%s3893_s5 + $0x58] sm:$0xff]  ;;  %v2540_v12 = vld [vmem:[%s3893_s5] sm:$0xff]  ;;  %v2549_v14 = vld [vmem:[%s3893_s5 + $0x8] sm:$0xff]  ;;  %s2589_s24 = scalar_select %p393_p0, %s2340_s30, 1 }
  0x20   : > { %v2559_v15 = vld [vmem:[%s3893_s5 + $0x30] sm:$0xff]  ;;  %v2566_v16 = vld [vmem:[%s3893_s5 + $0x48] sm:$0xff]  ;;  %v2575_v18 = vld [vmem:[%s3893_s5 + $0x60] sm:$0xff]  ;;  %s1802_s23 = scalar_lea.hbm %s3896_s8, %s1991_s19  ;;  %s2282_s19 = scalar_lea.hbm %s3896_s8, 16 }
  0x21   : > { %v2583_v19 = vld [vmem:[%s3893_s5 + $0x78] sm:$0xff]  ;;  %s1988_s11 = sshll.u32 %s2589_s24, 3  ;;  %s1990_s22 = sshll.u32 %s2589_s24, 7 }
  0x22   : > { %s400_s16 = scalar_lea.vmem %s3890_s2, %s1988_s11  ;;  %s410_s21 = scalar_lea.vmem %s3891_s3, %s1988_s11 }
  0x23   : > { %v439_v21 = vstv %s436_s25  ;;  %v438_v23 = vld [vmem:[%s400_s16] sm:$0xff]  ;;  %s2672_s24 = scalar_lea.vmem %s3892_s4, %s1990_s22  ;;  %s389_s16 = sand.u32 1, %s2332_s28  }
  0x24   : > { %v442_v22 = vstv %s437_s26  ;;  %v441_v24 = vld [vmem:[%s410_s21] sm:$0xff]  ;;  %v440_v26 = vmul.f32 %v439_v21, %v438_v23  ;;  %v979_v59 = vld [vmem:[%s2672_s24 + $0x68] sm:$0xff]  ;;  %v981_v62 = vld [vmem:[%s2672_s24 + $0x78] sm:$0xff]  ;;  %s1944_s20 = sshll.u32 %s389_s16, 3  ;;  %s1806_s26 = sshll.u32 %s1802_s23, 4  ;;  %s1807_s26 = int_to_ptr.hbm [resolvable:$true] %s1806_s26 }
  0x25   : > { %v443_v27 = vmul.f32 %v442_v22, %v441_v24  ;;  %s391_s25 = scalar_lea.vmem [#allocation7], %s1944_s20  ;;  %s1789_s30 = scalar_lea.sflag [#allocation3], %s389_s16 }
  0x26   : > { %472 = vperm.xlu2 %2073, %v425_v4   ;;  %s2276_s11 = sshra.s32 %s1807_s26, 4  ;;  %s2277_s11 = int_to_ptr.hbm [resolvable:$true] %s2276_s11 }
  0x27   : > { %593 = vperm.xlu0 %2076, %v2497_v5   ;;  %462 = vperm.xlu1 %2072, %v2502_v6   ;;  %v2613_v28 = vadd.f32 %v443_v27, %v440_v26  ;;  %s2278_s12 = scalar_lea.hbm %s2277_s11, 8  ;;  %p2283_p5 = scmp.lt.s32.totalorder %s2277_s11, %s3896_s8 }
  0x28   : > { %p2279_p1 = scmp.ne.s32.totalorder %s2277_s11, %s2278_s12  ;;  %p2284_p6 = scmp.lt.s32.totalorder %s2282_s19, %s2278_s12 }
  0x29   : > { %v526_v30 = vperm.slane %v2613_v28, 0  ;;  %v527_v31 = vperm.slane %v2613_v28, 4  ;;  %v628_v32 = vperm.slane %v2613_v28, 1  ;;  %v629_v33 = vperm.slane %v2613_v28, 5 }
  0x2a   : > { %p2280_p2 = pnand %p2279_p1, %p2441_p4  ;;  %p2285_p7 = por %p2284_p6, %p2283_p5 }
  0x2b   : > { %v2624_v34 = vperm.slane %v526_v30, 0  ;;  %v2626_v35 = vperm.slane %v527_v31, 0  ;;  %v2628_v36 = vperm.slane %v628_v32, 1  ;;  %v2630_v37 = vperm.slane %v629_v33, 1  ;;  %v977_v31 = vld [vmem:[%s2672_s24 + $0x58] sm:$0xff] }
  0x2c   : > { %p2281_p3 = pneg %p2280_p2 }
  0x2e   : > { %487 = vperm.xlu2 %2073, %v2509_v7   ;;  %p2286_p9 = pnand %p2285_p7, %p2281_p3 }
  0x2f   : > { %605 = vperm.xlu0 %2076, %v2514_v8   ;;  %482 = vperm.xlu1 %2072, %v2497_v5  }
  0x36   : > { %502 = vperm.xlu2 %2073, %v2522_v9  }
  0x37   : > { %617 = vperm.xlu0 %2076, %v2527_v10   ;;  %497 = vperm.xlu1 %2072, %v2514_v8  }
  0x3e   : > { %517 = vperm.xlu2 %2073, %v2535_v11  }
  0x3f   : > { %2077 = vset.pattern.permute.xlu0 %v2354_v13  ;;  %512 = vperm.xlu1 %2072, %v2527_v10  }
  0x40   : > { %699 = vperm.xlu0 %2077, %v2540_v12  }
  0x46   : > { %2075 = vset.pattern.permute.xlu2 %v2352_v2 }
  0x47   : > { %2074 = vset.pattern.permute.xlu1 %v2352_v2  ;;  %569 = vperm.xlu2 %2075, %v2549_v14  }
  0x48   : > { %719 = vperm.xlu0 %2077, %v425_v4   ;;  %565 = vperm.xlu1 %2074, %v2540_v12  }
  0x4f   : > { %581 = vperm.xlu2 %2075, %v2479_v0  }
  0x50   : > { %731 = vperm.xlu0 %2077, %v2509_v7   ;;  %577 = vperm.xlu1 %2074, %v2502_v6  }
  0x57   : > { %589 = vperm.xlu2 %2075, %v2559_v15  }
  0x58   : > { %739 = vperm.xlu0 %2077, %v2514_v8   ;;  %585 = vperm.xlu1 %2074, %v425_v4  }
  0x5f   : > { %601 = vperm.xlu2 %2075, %v2566_v16  }
  0x60   : > { %2085 = vset.pattern.permute.xlu0 %v2355_v17  ;;  %597 = vperm.xlu1 %2074, %v2509_v7  }
  0x61   : > { %889 = vperm.xlu0 %2085, %v2535_v11  }
  0x67   : > { %613 = vperm.xlu2 %2075, %v2575_v18  }
  0x68   : > { %609 = vperm.xlu1 %2074, %v2522_v9  }
  0x69   : > { %885 = vperm.xlu0 %2085, %v2527_v10  }
  0x6f   : > { %625 = vperm.xlu2 %2075, %v2583_v19  }
  0x70   : > { %621 = vperm.xlu1 %2074, %v2535_v11  }
  0x71   : > { %853 = vperm.xlu0 %2085, %v425_v4  }
  0x77   : > { %2079 = vset.pattern.permute.xlu2 %v2354_v13 }
  0x78   : > { %2078 = vset.pattern.permute.xlu1 %v2354_v13  ;;  %v2595_v20 = vpop.permute.xlu2 %467  ;;  %707 = vperm.xlu2 %2079, %v2484_v1  }
  0x79   : > { %2096 = vset.pattern.permute.xlu0 %v2353_v3  ;;  %703 = vperm.xlu1 %2078, %v2549_v14   ;;  %v541_v21 = vmul.f32 %v2626_v35, %v2595_v20 }
  0x7a   : > { %447 = vperm.xlu0 %2096, %v2540_v12  }
  0x80   : > { %v2608_v25 = vpop.permute.xlu2 %472  ;;  %715 = vperm.xlu2 %2079, %v2479_v0  }
  0x81   : > { %711 = vperm.xlu1 %2078, %v2502_v6  }
  0x82   : > { %452 = vperm.xlu0 %2096, %v2549_v14  }
  0x88   : > { %v2615_v29 = vpop.permute.xlu2 %487  ;;  %727 = vperm.xlu2 %2079, %v2497_v5  }
  0x89   : > { %723 = vperm.xlu1 %2078, %v2559_v15  }
  0x8a   : > { %477 = vperm.xlu0 %2096, %v2559_v15  }
  0x90   : > { %v2632_v38 = vpop.permute.xlu2 %502  ;;  %759 = vperm.xlu2 %2079, %v2583_v19  }
  0x91   : > { %v574_v39 = vpop.permute.xlu0 %573  ;;  %v458_v40 = vpop.permute.xlu1 %457  ;;  %755 = vperm.xlu1 %2078, %v2535_v11  }
  0x92   : > { %v638_v41 = vmul.f32 %v2628_v36, %v574_v39  ;;  %v639_v42 = vmul.f32 %v2630_v37, %v574_v39  ;;  %v536_v43 = vmul.f32 %v2624_v34, %v458_v40  ;;  %v537_v44 = vmul.f32 %v2626_v35, %v458_v40  ;;  %492 = vperm.xlu0 %2096, %v2566_v16  }
  0x94   : > { %v2641_v45 = vadd.f32 %v638_v41, %v536_v43  ;;  %v2643_v46 = vadd.f32 %v639_v42, %v537_v44 }
  0x98   : > { %v2645_v47 = vpop.permute.xlu2 %517  ;;  %747 = vperm.xlu2 %2079, %v2575_v18  }
  0x99   : > { %v2648_v48 = vpop.permute.xlu1 %462  ;;  %2080 = vset.pattern.permute.xlu1 %v2355_v17  ;;  %v594_v49 = vpop.permute.xlu0 %593 }
  0x9a   : > { %507 = vperm.xlu0 %2096, %v2575_v18   ;;  %893 = vperm.xlu1 %2080, %v2583_v19   ;;  %v648_v50 = vmul.f32 %v2628_v36, %v594_v49  ;;  %v649_v51 = vmul.f32 %v2630_v37, %v594_v49  ;;  %v974_v49 = vld [vmem:[%s2672_s24 + $0x40] sm:$0xff] }
  0xa0   : > { %2082 = vset.pattern.permute.xlu2 %v2355_v17 }
  0xa1   : > { %v483_v52 = vpop.permute.xlu1 %482  ;;  %v606_v53 = vpop.permute.xlu0 %605  ;;  %881 = vperm.xlu2 %2082, %v2575_v18   ;;  %v980_v18 = vld [vmem:[%s2672_s24 + $0x70] sm:$0xff] }
  0xa2   : > { %v546_v54 = vmul.f32 %v2624_v34, %v483_v52  ;;  %v547_v55 = vmul.f32 %v2626_v35, %v483_v52  ;;  %v2660_v56 = vpop.permute.xlu2 %569  ;;  %522 = vperm.xlu0 %2096, %v2583_v19   ;;  %2081 = vset.pattern.permute.xlu1 %v2354_v13  ;;  %v654_v60 = vmul.f32 %v2628_v36, %v606_v53  ;;  %v978_v52 = vld [vmem:[%s2672_s24 + $0x60] sm:$0xff] }
  0xa3   : > { %751 = vperm.xlu1 %2081, %v2527_v10   ;;  %v655_v61 = vmul.f32 %v2630_v37, %v606_v53  ;;  %v540_v19 = vmul.f32 %v2624_v34, %v2595_v20 }
  0xa4   : > { %v2664_v57 = vadd.f32 %v648_v50, %v546_v54  ;;  %v2666_v58 = vadd.f32 %v649_v51, %v547_v55 }
  0xa9   : > { %v498_v63 = vpop.permute.xlu1 %497  ;;  %v618_v2 = vpop.permute.xlu0 %617  ;;  %2084 = vset.pattern.permute.xlu2 %v2353_v3 }
  0xaa   : > { %v552_v4 = vmul.f32 %v2624_v34, %v498_v63  ;;  %v553_v10 = vmul.f32 %v2626_v35, %v498_v63  ;;  %v582_v11 = vpop.permute.xlu2 %581  ;;  %1049 = vperm.xlu0 %2096, %v979_v59   ;;  %1059 = vperm.xlu2 %2084, %v981_v62   ;;  %v660_v32 = vmul.f32 %v2628_v36, %v618_v2  ;;  %v762_v59 = vperm.slane %v2613_v28, 2 }
  0xab   : > { %v642_v22 = vmul.f32 %v2628_v36, %v582_v11  ;;  %v643_v23 = vmul.f32 %v2630_v37, %v582_v11  ;;  %2083 = vset.pattern.permute.xlu1 %v2353_v3  ;;  %v661_v20 = vmul.f32 %v2630_v37, %v618_v2  ;;  %v538_v62 = vmul.f32 %v2624_v34, %v2648_v48 }
  0xac   : > { %v686_v24 = vadd.f32 %v654_v60, %v552_v4  ;;  %v687_v26 = vadd.f32 %v655_v61, %v553_v10  ;;  %1054 = vperm.xlu1 %2083, %v980_v18   ;;  %v763_v60 = vperm.slane %v2613_v28, 6  ;;  %v539_v63 = vmul.f32 %v2626_v35, %v2648_v48  ;;  %v969_v48 = vld [vmem:[%s2672_s24 + $0x18] sm:$0xff] }
  0xad   : > { %v2689_v27 = vadd.f32 %v642_v22, %v540_v19  ;;  %v2691_v30 = vadd.f32 %v643_v23, %v541_v21  ;;  %v2736_v11 = vperm.slane %v762_v59, 2 }
  0xae   : > { %v2738_v18 = vperm.slane %v763_v60, 2 }
  0xb1   : > { %v513_v33 = vpop.permute.xlu1 %512 }
  0xb2   : > { %v558_v39 = vmul.f32 %v2624_v34, %v513_v33  ;;  %v559_v40 = vmul.f32 %v2626_v35, %v513_v33  ;;  %v2698_v41 = vpop.permute.xlu2 %589  ;;  %v2700_v42 = vpop.permute.xlu0 %699  ;;  %1039 = vperm.xlu0 %2096, %v977_v31   ;;  %2087 = vset.pattern.permute.xlu2 %v2355_v17  ;;  %v976_v33 = vld [vmem:[%s2672_s24 + $0x50] sm:$0xff] }
  0xb3   : > { %873 = vperm.xlu2 %2087, %v2514_v8   ;;  %v970_v8 = vld [vmem:[%s2672_s24 + $0x20] sm:$0xff] }
  0xb4   : > { %v2703_v43 = vadd.f32 %v660_v32, %v558_v39  ;;  %v2705_v44 = vadd.f32 %v661_v20, %v559_v40  ;;  %2086 = vset.pattern.permute.xlu1 %v2354_v13  ;;  %v543_v32 = vmul.f32 %v2626_v35, %v2608_v25 }
  0xb5   : > { %743 = vperm.xlu1 %2086, %v2522_v9  }
  0xba   : > { %v2711_v50 = vpop.permute.xlu2 %601  ;;  %v720_v51 = vpop.permute.xlu0 %719  ;;  %1024 = vperm.xlu0 %2096, %v974_v49  }
  0xbb   : > { %v2714_v53 = vpop.permute.xlu1 %565  ;;  %2089 = vset.pattern.permute.xlu2 %v2353_v3  ;;  %v778_v49 = vmul.f32 %v2736_v11, %v720_v51 }
  0xbc   : > { %1044 = vperm.xlu2 %2089, %v978_v52   ;;  %v779_v52 = vmul.f32 %v2738_v18, %v720_v51  ;;  %v548_v51 = vmul.f32 %v2624_v34, %v2615_v29 }
  0xbd   : > { %2088 = vset.pattern.permute.xlu1 %v2355_v17 }
  0xbe   : > { %877 = vperm.xlu1 %2088, %v2522_v9  }
  0xc2   : > { %v2720_v54 = vpop.permute.xlu2 %613  ;;  %v732_v55 = vpop.permute.xlu0 %731  ;;  %1004 = vperm.xlu0 %2096, %v970_v8  }
  0xc3   : > { %v578_v61 = vpop.permute.xlu1 %577 }
  0xc4   : > { %v640_v2 = vmul.f32 %v2628_v36, %v578_v61  ;;  %v641_v9 = vmul.f32 %v2630_v37, %v578_v61  ;;  %2091 = vset.pattern.permute.xlu2 %v2355_v17  ;;  %v549_v61 = vmul.f32 %v2626_v35, %v2615_v29 }
  0xc5   : > { %865 = vperm.xlu2 %2091, %v2509_v7   ;;  %v542_v7 = vmul.f32 %v2624_v34, %v2608_v25  ;;  %v418_v25 = vld [vmem:[%s3895_s7] sm:$0xf] }
  0xc6   : > { %v2731_v4 = vadd.f32 %v640_v2, %v538_v62  ;;  %v2733_v10 = vadd.f32 %v641_v9, %v539_v63  ;;  %2090 = vset.pattern.permute.xlu1 %v2354_v13 }
  0xc7   : > { %735 = vperm.xlu1 %2090, %v2566_v16  }
  0xca   : > { %v2743_v19 = vpop.permute.xlu2 %625  ;;  %v740_v21 = vpop.permute.xlu0 %739  ;;  %999 = vperm.xlu0 %2096, %v969_v48   ;;  %v784_v48 = vmul.f32 %v2736_v11, %v732_v55 }
  0xcb   : > { %v788_v22 = vmul.f32 %v2736_v11, %v740_v21  ;;  %v789_v23 = vmul.f32 %v2738_v18, %v740_v21  ;;  %v586_v31 = vpop.permute.xlu1 %585 }
  0xcc   : > { %v644_v13 = vmul.f32 %v2628_v36, %v586_v31  ;;  %v645_v20 = vmul.f32 %v2630_v37, %v586_v31 }
  0xcd   : > { %v2754_v39 = vadd.f32 %v788_v22, %v686_v24  ;;  %v2756_v40 = vadd.f32 %v789_v23, %v687_v26  ;;  %2093 = vset.pattern.permute.xlu2 %v2353_v3 }
  0xce   : > { %v676_v8 = vadd.f32 %v644_v13, %v542_v7  ;;  %v677_v59 = vadd.f32 %v645_v20, %v543_v32  ;;  %1034 = vperm.xlu2 %2093, %v976_v33  }
  0xcf   : > { %2092 = vset.pattern.permute.xlu1 %v2355_v17 }
  0xd0   : > { %869 = vperm.xlu1 %2092, %v2566_v16   ;;  %v810_v26 = vadd.f32 %v778_v49, %v676_v8  ;;  %v811_v60 = vadd.f32 %v779_v52, %v677_v59  ;;  %v785_v16 = vmul.f32 %v2738_v18, %v732_v55  ;;  %v554_v49 = vmul.f32 %v2624_v34, %v2632_v38 }
  0xd1   : > { %v897_v59 = vperm.slane %v2613_v28, 7 }
  0xd2   : > { %1752 = vperm.xlu0 %2096, %v418_v25   ;;  %v708_v24 = vpop.permute.xlu2 %707 }
  0xd3   : > { %v598_v62 = vpop.permute.xlu1 %597  ;;  %v772_v63 = vmul.f32 %v2736_v11, %v708_v24  ;;  %v773_v2 = vmul.f32 %v2738_v18, %v708_v24  ;;  %v2772_v9 = vpop.permute.xlu0 %889 }
  0xd4   : > { %v650_v21 = vmul.f32 %v2628_v36, %v598_v62  ;;  %v651_v22 = vmul.f32 %v2630_v37, %v598_v62 }
  0xd5   : > { %v2779_v23 = vadd.f32 %v772_v63, %v2641_v45  ;;  %v2782_v29 = vadd.f32 %v773_v2, %v2643_v46  ;;  %v2817_v63 = vperm.slane %v897_v59, 3 }
  0xd6   : > { %v682_v31 = vadd.f32 %v650_v21, %v548_v51  ;;  %v683_v7 = vadd.f32 %v651_v22, %v549_v61  ;;  %2094 = vset.pattern.permute.xlu2 %v2355_v17 }
  0xd7   : > { %3904 = vst [vmem:[#allocation11_spill] sm:$0xff] %v2779_v23  ;;  %861 = vperm.xlu2 %2094, %v2497_v5   ;;  %v555_v5 = vmul.f32 %v2626_v35, %v2632_v38  ;;  %v975_v38 = vld [vmem:[%s2672_s24 + $0x48] sm:$0xff] }
  0xd8   : > { %3905 = vst [vmem:[#allocation12_spill] sm:$0xff] %v2782_v29  ;;  %v2786_v32 = vadd.f32 %v784_v48, %v682_v31  ;;  %v2788_v13 = vadd.f32 %v785_v16, %v683_v7  ;;  %857 = vperm.xlu1 %2092, %v2559_v15   ;;  %v896_v15 = vperm.slane %v2613_v28, 3  ;;  %v973_v31 = vld [vmem:[%s2672_s24 + $0x38] sm:$0xff]  ;;  %v972_v7 = vld [vmem:[%s2672_s24 + $0x30] sm:$0xff] }
  0xda   : > { %v716_v55 = vpop.permute.xlu2 %715  ;;  %v2815_v62 = vperm.slane %v896_v15, 3 }
  0xdb   : > { %v610_v20 = vpop.permute.xlu1 %609  ;;  %v776_v45 = vmul.f32 %v2736_v11, %v716_v55  ;;  %v777_v46 = vmul.f32 %v2738_v18, %v716_v55  ;;  %v2793_v33 = vpop.permute.xlu0 %885 }
  0xdc   : > { %v656_v52 = vmul.f32 %v2628_v36, %v610_v20  ;;  %v657_v8 = vmul.f32 %v2630_v37, %v610_v20 }
  0xdd   : > { %v2804_v25 = vadd.f32 %v776_v45, %v2689_v27  ;;  %v2807_v24 = vadd.f32 %v777_v46, %v2691_v30  ;;  %v634_v46 = vmul.f32 %v2628_v36, %v2714_v53 }
  0xde   : > { %v2809_v51 = vadd.f32 %v656_v52, %v554_v49  ;;  %v2811_v61 = vadd.f32 %v657_v8, %v555_v5  ;;  %v635_v49 = vmul.f32 %v2630_v37, %v2714_v53 }
  0xdf   : > { %3906 = vst [vmem:[#allocation13_spill] sm:$0xff] %v2804_v25  ;;  %849 = vperm.xlu2 %2094, %v2479_v0  }
  0xe0   : > { %3907 = vst [vmem:[#allocation14_spill] sm:$0xff] %v2807_v24  ;;  %2095 = vset.pattern.permute.xlu1 %v2353_v3 }
  0xe1   : > { %1029 = vperm.xlu1 %2095, %v975_v38  }
  0xe2   : > { %v728_v28 = vpop.permute.xlu2 %727 }
  0xe3   : > { %v622_v27 = vpop.permute.xlu1 %621  ;;  %v782_v30 = vmul.f32 %v2736_v11, %v728_v28  ;;  %v783_v2 = vmul.f32 %v2738_v18, %v728_v28  ;;  %v854_v48 = vpop.permute.xlu0 %853  ;;  %v636_v28 = vmul.f32 %v2628_v36, %v2660_v56 }
  0xe4   : > { %v912_v0 = vmul.f32 %v2815_v62, %v854_v48  ;;  %v913_v22 = vmul.f32 %v2817_v63, %v854_v48 }
  0xe5   : > { %v2823_v16 = vadd.f32 %v782_v30, %v2664_v57  ;;  %v2826_v21 = vadd.f32 %v783_v2, %v2666_v58  ;;  %v637_v30 = vmul.f32 %v2630_v37, %v2660_v56 }
  0xe6   : > { %v2833_v55 = vadd.f32 %v912_v0, %v810_v26  ;;  %v2835_v20 = vadd.f32 %v913_v22, %v811_v60 }
  0xe7   : > { %2097 = vset.pattern.permute.xlu2 %v2353_v3 }
  0xe8   : > { %1019 = vperm.xlu2 %2097, %v973_v31   ;;  %3908 = vst [vmem:[#allocation15_spill] sm:$0xff] %v2833_v55  ;;  %v971_v31 = vld [vmem:[%s2672_s24 + $0x28] sm:$0xff] }
  0xe9   : > { %3909 = vst [vmem:[#allocation16_spill] sm:$0xff] %v2835_v20  ;;  %1014 = vperm.xlu1 %2095, %v972_v7  }
  0xea   : > { %v2837_v45 = vpop.permute.xlu2 %759 }
  0xeb   : > { %v2839_v57 = vpop.permute.xlu1 %703 }
  0xec   : > { %v448_v58 = vpop.permute.xlu0 %447 }
  0xed   : > { %v532_v5 = vmul.f32 %v2624_v34, %v448_v58  ;;  %v533_v52 = vmul.f32 %v2626_v35, %v448_v58 }
  0xef   : > { %v2847_v26 = vadd.f32 %v634_v46, %v532_v5  ;;  %v2849_v60 = vadd.f32 %v635_v49, %v533_v52  ;;  %v662_v5 = vmul.f32 %v2628_v36, %v622_v27 }
  0xf0   : > { %2099 = vset.pattern.permute.xlu2 %v2355_v17 }
  0xf1   : > { %2098 = vset.pattern.permute.xlu1 %v2355_v17  ;;  %845 = vperm.xlu2 %2099, %v2502_v6  }
  0xf2   : > { %841 = vperm.xlu1 %2098, %v2484_v1   ;;  %v2855_v8 = vpop.permute.xlu2 %747 }
  0xf3   : > { %v712_v53 = vpop.permute.xlu1 %711 }
  0xf4   : > { %v774_v15 = vmul.f32 %v2736_v11, %v712_v53  ;;  %v775_v59 = vmul.f32 %v2738_v18, %v712_v53  ;;  %v453_v38 = vpop.permute.xlu0 %452 }
  0xf5   : > { %v534_v2 = vmul.f32 %v2624_v34, %v453_v38  ;;  %v535_v6 = vmul.f32 %v2626_v35, %v453_v38  ;;  %v561_v38 = vmul.f32 %v2626_v35, %v2645_v47 }
  0xf6   : > { %v2866_v1 = vadd.f32 %v774_v15, %v2731_v4  ;;  %v2869_v48 = vadd.f32 %v775_v59, %v2733_v10  ;;  %v646_v4 = vmul.f32 %v2628_v36, %v2698_v41  ;;  %v647_v10 = vmul.f32 %v2630_v37, %v2698_v41  ;;  %v968_v15 = vld [vmem:[%s2672_s24 + $0x10] sm:$0xff] }
  0xf7   : > { %v2871_v0 = vadd.f32 %v636_v28, %v534_v2  ;;  %v2873_v22 = vadd.f32 %v637_v30, %v535_v6  ;;  %v560_v59 = vmul.f32 %v2624_v34, %v2645_v47  ;;  %v930_v30 = vmul.f32 %v2815_v62, %v2772_v9 }
  0xf8   : > { %3910 = vst [vmem:[#allocation17_spill] sm:$0xff] %v2866_v1 }
  0xf9   : > { %3911 = vst [vmem:[#allocation18_spill] sm:$0xff] %v2869_v48  ;;  %833 = vperm.xlu2 %2099, %v2540_v12   ;;  %v663_v12 = vmul.f32 %v2630_v37, %v622_v27  ;;  %v931_v27 = vmul.f32 %v2817_v63, %v2772_v9  ;;  %v694_v2 = vadd.f32 %v662_v5, %v560_v59  ;;  %v967_v59 = vld [vmem:[%s2672_s24 + $0x8] sm:$0xff] }
  0xfa   : > { %2100 = vset.pattern.permute.xlu1 %v2353_v3  ;;  %v652_v9 = vmul.f32 %v2628_v36, %v2711_v50 }
  0xfb   : > { %v724_v56 = vpop.permute.xlu1 %723  ;;  %v2878_v7 = vpop.permute.xlu2 %881  ;;  %1009 = vperm.xlu1 %2100, %v971_v31   ;;  %v695_v6 = vadd.f32 %v663_v12, %v561_v38 }
  0xfc   : > { %v478_v58 = vpop.permute.xlu0 %477  ;;  %v780_v28 = vmul.f32 %v2736_v11, %v724_v56  ;;  %v781_v41 = vmul.f32 %v2738_v18, %v724_v56 }
  0xfd   : > { %v544_v46 = vmul.f32 %v2624_v34, %v478_v58  ;;  %v545_v49 = vmul.f32 %v2626_v35, %v478_v58 }
  0xff   : > { %v678_v52 = vadd.f32 %v646_v4, %v544_v46  ;;  %v679_v53 = vadd.f32 %v647_v10, %v545_v49  ;;  %v653_v46 = vmul.f32 %v2630_v37, %v2711_v50  ;;  %v768_v50 = vmul.f32 %v2736_v11, %v2700_v42 }
 0x101   : > { %2102 = vset.pattern.permute.xlu2 %v2353_v3  ;;  %v2903_v4 = vadd.f32 %v780_v28, %v678_v52  ;;  %v2905_v10 = vadd.f32 %v781_v41, %v679_v53  ;;  %v769_v41 = vmul.f32 %v2738_v18, %v2700_v42  ;;  %v2940_v42 = vadd.f32 %v768_v50, %v2847_v26 }
 0x102   : > { %994 = vperm.xlu2 %2102, %v968_v15   ;;  %v926_v26 = vmul.f32 %v2815_v62, %v2878_v7 }
 0x103   : > { %v756_v31 = vpop.permute.xlu1 %755  ;;  %2101 = vset.pattern.permute.xlu1 %v2355_v17  ;;  %3912 = vst [vmem:[#allocation19_spill] sm:$0xff] %v2940_v42 }
 0x104   : > { %v796_v58 = vmul.f32 %v2736_v11, %v756_v31  ;;  %v797_v47 = vmul.f32 %v2738_v18, %v756_v31  ;;  %v493_v56 = vpop.permute.xlu0 %492  ;;  %837 = vperm.xlu1 %2101, %v2549_v14   ;;  %v2914_v12 = vpop.permute.xlu2 %1059  ;;  %v966_v14 = vld [vmem:[%s2672_s24] sm:$0xff]  ;;  %s1804_s24 = sshll.u32 %s391_s25, 4  ;;  %s1805_s24 = int_to_ptr.vmem [resolvable:$true] %s1804_s24 }
 0x105   : > { %v550_v49 = vmul.f32 %v2624_v34, %v493_v56  ;;  %v551_v5 = vmul.f32 %v2626_v35, %v493_v56  ;;  %v2943_v56 = vadd.f32 %v769_v41, %v2849_v60  ;;  %v927_v60 = vmul.f32 %v2817_v63, %v2878_v7 }
 0x106   : > { %v828_v17 = vadd.f32 %v796_v58, %v694_v2  ;;  %v829_v52 = vadd.f32 %v797_v47, %v695_v6  ;;  %v658_v2 = vmul.f32 %v2628_v36, %v2720_v54  ;;  %v659_v6 = vmul.f32 %v2630_v37, %v2720_v54 }
 0x107   : > { %v2916_v15 = vadd.f32 %v652_v9, %v550_v49  ;;  %v2918_v53 = vadd.f32 %v653_v46, %v551_v5  ;;  %3913 = vst [vmem:[#allocation20_spill] sm:$0xff] %v2943_v56  ;;  %v792_v54 = vmul.f32 %v2736_v11, %v2855_v8  ;;  %v793_v49 = vmul.f32 %v2738_v18, %v2855_v8 }
 0x108   : > { %v2921_v38 = vadd.f32 %v930_v30, %v828_v17  ;;  %v2923_v28 = vadd.f32 %v931_v27, %v829_v52  ;;  %v771_v5 = vmul.f32 %v2738_v18, %v2839_v57 }
 0x10a   : > { %989 = vperm.xlu2 %2102, %v967_v59   ;;  %v664_v59 = vmul.f32 %v2628_v36, %v2743_v19  ;;  %v2963_v41 = vadd.f32 %v771_v5, %v2873_v22  ;;  %v798_v36 = vmul.f32 %v2736_v11, %v2837_v45 }
 0x10c   : > { %v508_v31 = vpop.permute.xlu0 %507  ;;  %v894_v58 = vpop.permute.xlu1 %893  ;;  %2103 = vset.pattern.permute.xlu1 %v2353_v3  ;;  %v770_v3 = vmul.f32 %v2736_v11, %v2839_v57  ;;  %3915 = vst [vmem:[#allocation22_spill] sm:$0xff] %v2963_v41  ;;  %v665_v57 = vmul.f32 %v2630_v37, %v2743_v19 }
 0x10d   : > { %v556_v30 = vmul.f32 %v2624_v34, %v508_v31  ;;  %v557_v27 = vmul.f32 %v2626_v35, %v508_v31  ;;  %984 = vperm.xlu1 %2103, %v966_v14   ;;  %v2937_v47 = vpop.permute.xlu2 %873  ;;  %v928_v14 = vmul.f32 %v2815_v62, %v2793_v33 }
 0x10e   : > { %v2960_v8 = vadd.f32 %v770_v3, %v2871_v0  ;;  %v799_v0 = vmul.f32 %v2738_v18, %v2837_v45 }
 0x10f   : > { %v690_v9 = vadd.f32 %v658_v2, %v556_v30  ;;  %v691_v46 = vadd.f32 %v659_v6, %v557_v27 }
 0x110   : > { %3914 = vst [vmem:[#allocation21_spill] sm:$0xff] %v2960_v8 }
 0x111   : > { %v824_v17 = vadd.f32 %v792_v54, %v690_v9  ;;  %v825_v52 = vadd.f32 %v793_v49, %v691_v46 }
 0x113   : > { %v958_v6 = vadd.f32 %v926_v26, %v824_v17  ;;  %v959_v22 = vadd.f32 %v927_v60, %v825_v52  ;;  %v933_v60 = vmul.f32 %v2817_v63, %v894_v58 }
 0x114   : > { %v523_v50 = vpop.permute.xlu0 %522 }
 0x115   : > { %v562_v7 = vmul.f32 %v2624_v34, %v523_v50  ;;  %v563_v31 = vmul.f32 %v2626_v35, %v523_v50  ;;  %v752_v2 = vpop.permute.xlu1 %751  ;;  %v929_v34 = vmul.f32 %v2817_v63, %v2793_v33  ;;  %v932_v35 = vmul.f32 %v2815_v62, %v894_v58 }
 0x116   : > { %v794_v37 = vmul.f32 %v2736_v11, %v752_v2  ;;  %v795_v19 = vmul.f32 %v2738_v18, %v752_v2  ;;  %v1045_v9 = vpop.permute.xlu2 %1044 }
 0x117   : > { %v696_v30 = vadd.f32 %v664_v59, %v562_v7  ;;  %v697_v27 = vadd.f32 %v665_v57, %v563_v31  ;;  %v2980_v46 = vadd.f32 %v1045_v9, %v958_v6  ;;  %v2982_v54 = vadd.f32 %v1045_v9, %v959_v22 }
 0x118   : > { %v826_v3 = vadd.f32 %v794_v37, %v2703_v43  ;;  %v827_v5 = vadd.f32 %v795_v19, %v2705_v44  ;;  %v922_v19 = vmul.f32 %v2815_v62, %v2937_v47 }
 0x119   : > { %v830_v45 = vadd.f32 %v798_v36, %v696_v30  ;;  %v831_v49 = vadd.f32 %v799_v0, %v697_v27  ;;  %v1975_v26 = vmul.f32 -1.442695, %v2980_v46  ;;  %v1976_v33 = vmul.f32 -1.442695, %v2982_v54 }
 0x11a   : > { %v960_v17 = vadd.f32 %v928_v14, %v826_v3  ;;  %v961_v52 = vadd.f32 %v929_v34, %v827_v5  ;;  %v954_v5 = vadd.f32 %v922_v19, %v2754_v39 }
 0x11b   : > { %v964_v59 = vadd.f32 %v932_v35, %v830_v45  ;;  %v965_v43 = vadd.f32 %v933_v60, %v831_v49  ;;  %2104 = vpow2.f32 %v1975_v26 }
 0x11c   : > { %v1050_v50 = vpop.permute.xlu0 %1049  ;;  %2106 = vpow2.f32 %v1976_v33 }
 0x11d   : > { %v2989_v57 = vadd.f32 %v1050_v50, %v960_v17  ;;  %v2991_v7 = vadd.f32 %v1050_v50, %v961_v52  ;;  %v2994_v31 = vadd.f32 %v2914_v12, %v964_v59  ;;  %v3006_v22 = vadd.f32 %v2914_v12, %v965_v43 }
 0x11e   : > { %v1055_v58 = vpop.permute.xlu1 %1054  ;;  %v923_v12 = vmul.f32 %v2817_v63, %v2937_v47 }
 0x11f   : > { %v1977_v44 = vmul.f32 -1.442695, %v2989_v57  ;;  %v1978_v36 = vmul.f32 -1.442695, %v2991_v7  ;;  %v1981_v14 = vmul.f32 -1.442695, %v2994_v31  ;;  %v3000_v0 = vadd.f32 %v1055_v58, %v2921_v38  ;;  %v866_v6 = vpop.permute.xlu2 %865 }
 0x120   : > { %v3003_v2 = vadd.f32 %v1055_v58, %v2923_v28  ;;  %v1982_v28 = vmul.f32 -1.442695, %v3006_v22  ;;  %v918_v49 = vmul.f32 %v2815_v62, %v866_v6  ;;  %v919_v60 = vmul.f32 %v2817_v63, %v866_v6 }
 0x121   : > { %2108 = vpow2.f32 %v1977_v44  ;;  %v1979_v30 = vmul.f32 -1.442695, %v3000_v0  ;;  %v2105_v37 = vpop.eup %2104  ;;  %v955_v47 = vadd.f32 %v923_v12, %v2756_v40 }
 0x122   : > { %2110 = vpow2.f32 %v1978_v36  ;;  %v1980_v27 = vmul.f32 -1.442695, %v3003_v2  ;;  %v2107_v9 = vpop.eup %2106  ;;  %v3017_v35 = vadd.f32 1.0, %v2105_v37  ;;  %v950_v58 = vadd.f32 %v918_v49, %v2786_v32 }
 0x123   : > { %2112 = vpow2.f32 %v1981_v14  ;;  %v3022_v59 = vadd.f32 1.0, %v2107_v9  ;;  %v951_v40 = vadd.f32 %v919_v60, %v2788_v13 }
 0x124   : > { %2114 = vpow2.f32 %v1979_v30  ;;  %v3012_v38 = vpop.permute.xlu0 %1039  ;;  %v1593_v30 = vand.u32 2147483648, %v3017_v35  ;;  %vm1587_vm12 = vweird.f32 %v3017_v35 }
 0x125   : > { %2116 = vpow2.f32 %v1980_v27  ;;  %v1608_v19 = vand.u32 2147483648, %v3022_v59 }
 0x126   : > { %2118 = vpow2.f32 %v1982_v28 }
 0x127   : > { %v2109_v34 = vpop.eup %2108  ;;  %v744_v3 = vpop.permute.xlu1 %743  ;;  %2120 = vrcp.f32 %v3017_v35 }
 0x128   : > { %v2111_v45 = vpop.eup %2110  ;;  %v1035_v17 = vpop.permute.xlu2 %1034  ;;  %v3030_v43 = vadd.f32 1.0, %v2109_v34  ;;  %v790_v28 = vmul.f32 %v2736_v11, %v744_v3  ;;  %v791_v9 = vmul.f32 %v2738_v18, %v744_v3  ;;  %v3063_v3 = vor.u32 1.1754944e-38, %v1593_v30 }
 0x129   : > { %v2113_v26 = vpop.eup %2112  ;;  %v3025_v33 = vadd.f32 %v1035_v17, %v954_v5  ;;  %v3034_v39 = vadd.f32 %v1035_v17, %v955_v47  ;;  %v3038_v6 = vadd.f32 1.0, %v2111_v45 }
 0x12a   : > { %v2115_v52 = vpop.eup %2114  ;;  %v3027_v50 = vadd.f32 1.0, %v2113_v26  ;;  %v822_v34 = vadd.f32 %v790_v28, %v2809_v51 }
 0x12b   : > { %3916 = vst [vmem:[#allocation23_spill] sm:$0xff] %v3025_v33  ;;  %v3032_v44 = vadd.f32 1.0, %v2115_v52  ;;  %v2117_v14 = vpop.eup %2116  ;;  %v1971_v37 = vmul.f32 -1.442695, %v3025_v33  ;;  %v1972_v13 = vmul.f32 -1.442695, %v3034_v39 }
 0x12c   : > { %3917 = vst [vmem:[#allocation24_spill] sm:$0xff] %v3034_v39  ;;  %v1025_v36 = vpop.permute.xlu0 %1024  ;;  %2122 = vrcp.f32 %v3027_v50  ;;  %v3044_v27 = vadd.f32 1.0, %v2117_v14  ;;  %v2119_v32 = vpop.eup %2118  ;;  %v3070_v14 = vor.u32 1.1754944e-38, %v1608_v19  ;;  %vm1677_vm0 = vweird.f32 %v3027_v50 }
 0x12d   : > { %2124 = vrcp.f32 %v3032_v44  ;;  %v3051_v12 = vadd.f32 %v1025_v36, %v950_v58  ;;  %v3057_v49 = vpop.eup %2120  ;;  %v3060_v5 = vadd.f32 %v1025_v36, %v951_v40  ;;  %v1651_v60 = vand.u32 2147483647, %v3032_v44 }
 0x12e   : > { %2126 = vrcp.f32 %v3022_v59  ;;  %v1653_v47 = vand.u32 2147483648, %v3032_v44  ;;  %v3068_v58 = vadd.f32 1.0, %v2119_v32  ;;  %v823_v36 = vadd.f32 %v791_v9, %v2811_v61 }
 0x12f   : > { %2128 = vrcp.f32 %v3030_v43  ;;  %3918 = vst [vmem:[#allocation25_spill] sm:$0xff] %v3051_v12  ;;  %v1967_v40 = vmul.f32 -1.442695, %v3051_v12  ;;  %v1681_v19 = vand.u32 2147483647, %v3027_v50  ;;  %vm1647_vm1 = vweird.f32 %v3032_v44 }
 0x130   : > { %2130 = vrcp.f32 %v3044_v27  ;;  %3919 = vst [vmem:[#allocation26_spill] sm:$0xff] %v3060_v5  ;;  %v878_v26 = vpop.permute.xlu1 %877  ;;  %v1968_v51 = vmul.f32 -1.442695, %v3060_v5  ;;  %vm3086_vm2 = vcmp.eq.f32.partialorder %v1651_v60, 8.507059e+37  ;;  %v1683_v56 = vand.u32 2147483648, %v3027_v50 }
 0x131   : > { %2132 = vrcp.f32 %v3038_v6  ;;  %v862_v52 = vpop.permute.xlu2 %861  ;;  %vm3097_vm5 = vcmp.eq.f32.partialorder %v1681_v19, 8.507059e+37  ;;  %vm1662_vm6 = vweird.f32 %v3044_v27  ;;  %vm1692_vm10 = vweird.f32 %v3068_v58 }
 0x132   : > { %v3065_v17 = vpop.eup %2122  ;;  %2134 = vpow2.f32 %v1971_v37  ;;  %v916_v8 = vmul.f32 %v2815_v62, %v862_v52  ;;  %v3926_v61 = vand.u32 2147483647, %v3017_v35 }
 0x133   : > { %v2125_v45 = vpop.eup %2124  ;;  %v1673_v30 = vmul.f32 %v3065_v17, %v3027_v50  ;;  %2136 = vpow2.f32 %v1972_v13  ;;  %v1654_v13 = vor.u32 1.1754944e-38, %v1653_v47  ;;  %vm1678_vm3 = vweird.f32 %v3065_v17 }
 0x134   : > { %v3077_v48 = vpop.eup %2126  ;;  %v1643_v37 = vmul.f32 %v2125_v45, %v3032_v44  ;;  %2138 = vrcp.f32 %v3068_v58  ;;  %vm1648_vm4 = vweird.f32 %v2125_v45  ;;  %v924_v47 = vmul.f32 %v2815_v62, %v878_v26  ;;  %vm3114_vm7 = vmor %vm1677_vm0, %vm1678_vm3 }
 0x135   : > { %v3082_v32 = vpop.eup %2128  ;;  %v1674_v28 = vsub.f32 1.0, %v1673_v30  ;;  %2140 = vpow2.f32 %v1967_v40  ;;  %vm1649_vm8 = vmor %vm1647_vm1, %vm1648_vm4  ;;  %vm3155_vm14 = vcmp.eq.f32.partialorder %v3926_v61, 8.507059e+37  ;;  %vm1602_vm1 = vweird.f32 %v3022_v59 }
 0x136   : > { %v2131_v9 = vpop.eup %2130  ;;  %v1644_v1 = vsub.f32 1.0, %v1643_v37  ;;  %v925_v37 = vmul.f32 %v2817_v63, %v878_v26  ;;  %2142 = vpow2.f32 %v1968_v51  ;;  %v1684_v26 = vor.u32 1.1754944e-38, %v1683_v56 }
 0x137   : > { %v3092_v42 = vpop.eup %2132  ;;  %v1675_v24 = vmul.f32 %v3065_v17, %v1674_v28  ;;  %v1658_v60 = vmul.f32 %v2131_v9, %v3044_v27  ;;  %v917_v51 = vmul.f32 %v2817_v63, %v862_v52  ;;  %vm1663_vm9 = vweird.f32 %v2131_v9 }
 0x138   : > { %v2135_v25 = vpop.eup %2134  ;;  %v1645_v5 = vmul.f32 %v2125_v45, %v1644_v1  ;;  %v3131_v52 = vadd.f32 %v924_v47, %v822_v34  ;;  %v3133_v39 = vadd.f32 %v925_v37, %v823_v36  ;;  %vm1664_vm11 = vmor %vm1662_vm6, %vm1663_vm9  ;;  %v948_v47 = vadd.f32 %v916_v8, %v2823_v16 }
 0x139   : > { %v1676_v40 = vadd.f32 %v3065_v17, %v1675_v24  ;;  %v1659_v28 = vsub.f32 1.0, %v1658_v60  ;;  %v2137_v41 = vpop.eup %2136  ;;  %v3106_v20 = vpop.permute.xlu1 %735  ;;  %v3118_v24 = vadd.f32 1.0, %v2135_v25  ;;  %v1666_v60 = vand.u32 2147483647, %v3044_v27 }
 0x13a   : > { %v3108_v1 = vpop.permute.xlu2 %849  ;;  %v1646_v19 = vadd.f32 %v2125_v45, %v1645_v5  ;;  %v1668_v5 = vand.u32 2147483648, %v3044_v27  ;;  %v2139_v29 = vpop.eup %2138  ;;  %v3129_v56 = vadd.f32 1.0, %v2137_v41  ;;  %v1583_v27 = vmul.f32 %v3057_v49, %v3017_v35 }
 0x13b   : > { %v1680_v50 = vsel %vm3114_vm7, %v3065_v17, %v1676_v40  ;;  %v1660_v23 = vmul.f32 %v2131_v9, %v1659_v28  ;;  %v2141_v25 = vpop.eup %2140  ;;  %v1688_v34 = vmul.f32 %v2139_v29, %v3068_v58  ;;  %v1696_v17 = vand.u32 2147483647, %v3068_v58 }
 0x13c   : > { %v1650_v55 = vsel %vm1649_vm8, %v2125_v45, %v1646_v19  ;;  %v1685_v33 = vsel %vm3097_vm5, %v1684_v26, %v1680_v50  ;;  %v1669_v41 = vor.u32 1.1754944e-38, %v1668_v5  ;;  %2144 = vrcp.f32 %v3118_v24 }
 0x13d   : > { %v1655_v44 = vsel %vm3086_vm2, %v1654_v13, %v1650_v55  ;;  %v1661_v19 = vadd.f32 %v2131_v9, %v1660_v23  ;;  %v1732_v12 = vmul.f32 %v1685_v33, %v2994_v31  ;;  %v3147_v55 = vpop.eup %2142  ;;  %vm1667_vm13 = vcmp.eq.f32.partialorder %v1666_v60, 8.507059e+37 }
 0x13e   : > { %v1730_v45 = vmul.f32 %v1655_v44, %v3000_v0  ;;  %v1698_v23 = vand.u32 2147483648, %v3068_v58  ;;  %v1689_v33 = vsub.f32 1.0, %v1688_v34  ;;  %v3159_v30 = vadd.f32 1.0, %v2141_v25 }
 0x13f   : > { %v1665_v0 = vsel %vm1664_vm11, %v2131_v9, %v1661_v19  ;;  %v3163_v9 = vmul.f32 %v2736_v11, %v3106_v20  ;;  %v1613_v37 = vmul.f32 %v3082_v32, %v3030_v43  ;;  %vm1693_vm15 = vweird.f32 %v2139_v29 }
 0x140   : > { %v1748_v36 = vpack.c.bf16 %v1732_v12, %v1730_v45  ;;  %v1670_v31 = vsel %vm1667_vm13, %v1669_v41, %v1665_v0  ;;  %v1690_v40 = vmul.f32 %v2139_v29, %v1689_v33  ;;  %vm3168_vm0 = vcmp.eq.f32.partialorder %v1696_v17, 8.507059e+37  ;;  %vm1694_vm3 = vmor %vm1692_vm10, %vm1693_vm15 }
 0x141   : > { %v1584_v5 = vsub.f32 1.0, %v1583_v27  ;;  %v1699_v50 = vor.u32 1.1754944e-38, %v1698_v23  ;;  %v1731_v25 = vmul.f32 %v1670_v31, %v3003_v2  ;;  %v949_v11 = vadd.f32 %v917_v51, %v2826_v21 }
 0x142   : > { %1755 = vmatpush.bf16.msra.mxu0 %v1748_v36  ;;  %v870_v26 = vpop.permute.xlu1 %869  ;;  %v1020_v60 = vpop.permute.xlu2 %1019  ;;  %v1691_v16 = vadd.f32 %v2139_v29, %v1690_v40  ;;  %vm1588_vm2 = vweird.f32 %v3057_v49  ;;  %v1614_v45 = vsub.f32 1.0, %v1613_v37  ;;  %vm1618_vm4 = vweird.f32 %v3082_v32 }
 0x143   : > { %v3174_v44 = vadd.f32 %v1020_v60, %v948_v47  ;;  %v1585_v8 = vmul.f32 %v3057_v49, %v1584_v5  ;;  %v3179_v19 = vpop.eup %2144  ;;  %v1621_v21 = vand.u32 2147483647, %v3030_v43  ;;  %v1623_v2 = vand.u32 2147483648, %v3030_v43  ;;  %vm1589_vm5 = vmor %vm1587_vm12, %vm1588_vm2 }
 0x144   : > { %v1598_v51 = vmul.f32 %v3077_v48, %v3022_v59  ;;  %v1695_v12 = vsel %vm1694_vm3, %v2139_v29, %v1691_v16  ;;  %v1615_v17 = vmul.f32 %v3082_v32, %v1614_v45  ;;  %v3194_v0 = vadd.f32 %v1020_v60, %v949_v11 }
 0x145   : > { %v1965_v41 = vmul.f32 -1.442695, %v3174_v44  ;;  %v1586_v34 = vadd.f32 %v3057_v49, %v1585_v8  ;;  %v1700_v58 = vsel %vm3168_vm0, %v1699_v50, %v1695_v12  ;;  %vm1617_vm6 = vweird.f32 %v3030_v43 }
 0x146   : > { %v1599_v23 = vsub.f32 1.0, %v1598_v51  ;;  %v3931_v36 = vand.u32 2147483647, %v3022_v59  ;;  %v1733_v31 = vmul.f32 %v1700_v58, %v3006_v22  ;;  %v1616_v27 = vadd.f32 %v3082_v32, %v1615_v17  ;;  %vm1619_vm9 = vmor %vm1617_vm6, %vm1618_vm4 }
 0x147   : > { %v1590_v33 = vsel %vm1589_vm5, %v3057_v49, %v1586_v34  ;;  %vm1603_vm8 = vweird.f32 %v3077_v48  ;;  %v1624_v43 = vor.u32 1.1754944e-38, %v1623_v2  ;;  %v1628_v47 = vmul.f32 %v3092_v42, %v3038_v6 }
 0x148   : > { %vm3201_vm7 = vcmp.eq.f32.partialorder %v3931_v36, 8.507059e+37  ;;  %v1595_v35 = vsel %vm3155_vm14, %v3063_v3, %v1590_v33  ;;  %v1600_v61 = vmul.f32 %v3077_v48, %v1599_v23  ;;  %v1749_v22 = vpack.c.bf16 %v1733_v31, %v1731_v25  ;;  %vm3230_vm11 = vmor %vm1602_vm1, %vm1603_vm8 }
 0x149   : > { %2146 = vpow2.f32 %v1965_v41  ;;  %v1620_v49 = vsel %vm1619_vm9, %v3082_v32, %v1616_v27  ;;  %vm1622_vm10 = vcmp.eq.f32.partialorder %v1621_v21, 8.507059e+37  ;;  %v787_v13 = vmul.f32 %v2738_v18, %v3106_v20 }
 0x14a   : > { %v3218_v37 = vpop.permute.xlu1 %857  ;;  %v1625_v3 = vsel %vm1622_vm10, %v1624_v43, %v1620_v49  ;;  %v1601_v40 = vadd.f32 %v3077_v48, %v1600_v61  ;;  %v1629_v28 = vsub.f32 1.0, %v1628_v47  ;;  %1768 = vmatpush.bf16.msra.mxu1 %v1749_v22  ;;  %v1966_v60 = vmul.f32 -1.442695, %v3194_v0 }
 0x14b   : > { %v1726_v5 = vmul.f32 %v1595_v35, %v2980_v46  ;;  %v1728_v50 = vmul.f32 %v1625_v3, %v2989_v57  ;;  %v1638_v18 = vand.u32 2147483648, %v3038_v6  ;;  %vm1633_vm12 = vweird.f32 %v3092_v42 }
 0x14c   : > { %v1605_v20 = vsel %vm3230_vm11, %v3077_v48, %v1601_v40  ;;  %v1630_v25 = vmul.f32 %v3092_v42, %v1629_v28  ;;  %v1636_v46 = vand.u32 2147483647, %v3038_v6  ;;  %2148 = vrcp.f32 %v3129_v56 }
 0x14d   : > { %v920_v57 = vmul.f32 %v2815_v62, %v870_v26  ;;  %v921_v59 = vmul.f32 %v2817_v63, %v870_v26  ;;  %v1746_v11 = vpack.c.bf16 %v1728_v50, %v1726_v5  ;;  %v3245_v16 = vadd.f32 1.0, %v3147_v55 }
 0x14e   : > { %2150 = vrcp.f32 %v3159_v30  ;;  %v1631_v48 = vadd.f32 %v3092_v42, %v1630_v25  ;;  %vm1632_vm13 = vweird.f32 %v3038_v6  ;;  %v818_v45 = vadd.f32 %v3163_v9, %v2916_v15 }
 0x14f   : > { %v2147_v8 = vpop.eup %2146  ;;  %v819_v21 = vadd.f32 %v787_v13, %v2918_v53  ;;  %1756 = vmatpush.bf16.msra.mxu0 %v1746_v11  ;;  %v1610_v26 = vsel %vm3201_vm7, %v3070_v14, %v1605_v20  ;;  %vm1634_vm14 = vmor %vm1632_vm13, %vm1633_vm12  ;;  %v1639_v55 = vor.u32 1.1754944e-38, %v1638_v18  ;;  %2152 = vpow2.f32 %v1966_v60  ;;  %v3311_v18 = vpop.permute.xlu2 %845 }
 0x150   : > { %v1635_v2 = vsel %vm1634_vm14, %v3092_v42, %v1631_v48  ;;  %vm1637_vm15 = vcmp.eq.f32.partialorder %v1636_v46, 8.507059e+37  ;;  %v3261_v6 = vadd.f32 %v3012_v38, %v3131_v52  ;;  %v952_v9 = vadd.f32 %v920_v57, %v818_v45 }
 0x151   : > { %v1640_v15 = vsel %vm1637_vm15, %v1639_v55, %v1635_v2  ;;  %v953_v53 = vadd.f32 %v921_v59, %v819_v21  ;;  %v1523_v51 = vmul.f32 %v3179_v19, %v3118_v24  ;;  %v3265_v12 = vadd.f32 1.0, %v2147_v8 }
 0x152   : > { %v1727_v14 = vmul.f32 %v1610_v26, %v2982_v54  ;;  %v1729_v41 = vmul.f32 %v1640_v15, %v2991_v7  ;;  %v1973_v42 = vmul.f32 -1.442695, %v3261_v6  ;;  %v3270_v17 = vpop.eup %2148  ;;  %v3283_v31 = vadd.f32 %v3012_v38, %v3133_v39 }
 0x153   : > { %v1030_v34 = vpop.permute.xlu1 %1029  ;;  %v1524_v29 = vsub.f32 1.0, %v1523_v51  ;;  %v914_v27 = vmul.f32 %v2815_v62, %v3218_v37  ;;  %v1538_v43 = vmul.f32 %v3270_v17, %v3129_v56  ;;  %v3293_v61 = vmul.f32 %v2815_v62, %v3108_v1 }
 0x154   : > { %v3272_v58 = vadd.f32 %v1030_v34, %v952_v9  ;;  %v3274_v52 = vadd.f32 %v1030_v34, %v953_v53  ;;  %v3276_v23 = vpop.eup %2150  ;;  %v1747_v36 = vpack.c.bf16 %v1729_v41, %v1727_v14  ;;  %2154 = vpow2.f32 %v1973_v42 }
 0x155   : > { %2156 = vrcp.f32 %v3245_v16  ;;  %v2153_v33 = vpop.eup %2152  ;;  %v1525_v35 = vmul.f32 %v3179_v19, %v1524_v29  ;;  %v1533_v38 = vand.u32 2147483648, %v3118_v24  ;;  %v1974_v39 = vmul.f32 -1.442695, %v3283_v31 }
 0x156   : > { %v1969_v54 = vmul.f32 -1.442695, %v3272_v58  ;;  %v1970_v7 = vmul.f32 -1.442695, %v3274_v52  ;;  %2158 = vrcp.f32 %v3265_v12  ;;  %1769 = vmatpush.bf16.msra.mxu1 %v1747_v36  ;;  %vm1528_vm0 = vweird.f32 %v3179_v19 }
 0x157   : > { %v1526_v47 = vadd.f32 %v3179_v19, %v1525_v35  ;;  %v1539_v22 = vsub.f32 1.0, %v1538_v43  ;;  %v3299_v49 = vadd.f32 1.0, %v2153_v33  ;;  %v915_v13 = vmul.f32 %v2817_v63, %v3218_v37 }
 0x158   : > { %2160 = vpow2.f32 %v1969_v54  ;;  %vm1527_vm1 = vweird.f32 %v3118_v24  ;;  %v1531_v40 = vand.u32 2147483647, %v3118_v24  ;;  %v946_v5 = vadd.f32 %v914_v27, %v2903_v4 }
 0x159   : > { %2162 = vpow2.f32 %v1970_v7  ;;  %v1540_v28 = vmul.f32 %v3270_v17, %v1539_v22  ;;  %v1463_v50 = vmul.f32 %v3276_v23, %v3159_v30  ;;  %vm3317_vm2 = vmor %vm1527_vm1, %vm1528_vm0  ;;  %v1534_v24 = vor.u32 1.1754944e-38, %v1533_v38 }
 0x15a   : > { %2164 = vpow2.f32 %v1974_v39  ;;  %v2155_v3 = vpop.eup %2154  ;;  %vm1543_vm3 = vweird.f32 %v3270_v17  ;;  %v1546_v4 = vand.u32 2147483647, %v3129_v56  ;;  %v1530_v46 = vsel %vm3317_vm2, %v3179_v19, %v1526_v47  ;;  %v3382_v47 = vpop.permute.xlu2 %833 }
 0x15b   : > { %v1015_v60 = vpop.permute.xlu1 %1014  ;;  %v3309_v32 = vpop.eup %2156  ;;  %v3313_v20 = vadd.f32 1.0, %v2155_v3  ;;  %v1541_v57 = vadd.f32 %v3270_v17, %v1540_v28  ;;  %v1464_v11 = vsub.f32 1.0, %v1463_v50  ;;  %vm1542_vm4 = vweird.f32 %v3129_v56 }
 0x15c   : > { %v3323_v25 = vpop.eup %2158  ;;  %v3329_v59 = vadd.f32 %v1015_v60, %v946_v5  ;;  %v1548_v8 = vand.u32 2147483648, %v3129_v56  ;;  %v947_v45 = vadd.f32 %v915_v13, %v2905_v10  ;;  %v3337_v26 = vmul.f32 %v2817_v63, %v3108_v1  ;;  %vm3344_vm6 = vmor %vm1542_vm4, %vm1543_vm3  ;;  %v3945_v5 = vld [vmem:[#allocation24_spill] sm:$0xff] }
 0x15d   : > { %2166 = vrcp.f32 %v3313_v20  ;;  %vm1532_vm5 = vcmp.eq.f32.partialorder %v1531_v40, 8.507059e+37  ;;  %v1545_v10 = vsel %vm3344_vm6, %v3270_v17, %v1541_v57  ;;  %vm3351_vm7 = vcmp.eq.f32.partialorder %v1546_v4, 8.507059e+37  ;;  %v3942_v17 = vld [vmem:[#allocation23_spill] sm:$0xff] }
 0x15e   : > { %v2161_v48 = vpop.eup %2160  ;;  %2168 = vrcp.f32 %v3299_v49  ;;  %v1535_v56 = vsel %vm1532_vm5, %v1534_v24, %v1530_v46  ;;  %v3355_v15 = vadd.f32 %v1015_v60, %v947_v45  ;;  %v1963_v53 = vmul.f32 -1.442695, %v3329_v59 }
 0x15f   : > { %v2163_v21 = vpop.eup %2162  ;;  %v3340_v19 = vadd.f32 1.0, %v2161_v48  ;;  %v1465_v51 = vmul.f32 %v3276_v23, %v1464_v11  ;;  %v1561_v14 = vand.u32 2147483647, %v3313_v20  ;;  %v1563_v41 = vand.u32 2147483648, %v3313_v20 }
 0x160   : > { %v2165_v2 = vpop.eup %2164  ;;  %v1549_v34 = vor.u32 1.1754944e-38, %v1548_v8  ;;  %vm1467_vm8 = vweird.f32 %v3159_v30  ;;  %v3365_v42 = vadd.f32 1.0, %v2163_v21  ;;  %v3368_v36 = vmul.f32 %v1535_v56, %v3942_v17 }
 0x161   : > { %2170 = vrcp.f32 %v3340_v19  ;;  %v3358_v9 = vadd.f32 1.0, %v2165_v2  ;;  %vm1468_vm9 = vweird.f32 %v3276_v23  ;;  %vm1557_vm10 = vweird.f32 %v3313_v20 }
 0x162   : > { %v1550_v54 = vsel %vm3351_vm7, %v1549_v34, %v1545_v10  ;;  %v1964_v7 = vmul.f32 -1.442695, %v3355_v15  ;;  %v1466_v27 = vadd.f32 %v3276_v23, %v1465_v51  ;;  %v1471_v38 = vand.u32 2147483647, %v3159_v30  ;;  %vm3398_vm12 = vmor %vm1467_vm8, %vm1468_vm9 }
 0x163   : > { %2172 = vrcp.f32 %v3358_v9  ;;  %v2167_v29 = vpop.eup %2166  ;;  %v1473_v39 = vand.u32 2147483648, %v3159_v30  ;;  %vm3384_vm11 = vcmp.eq.f32.partialorder %v1561_v14, 8.507059e+37  ;;  %v1564_v13 = vor.u32 1.1754944e-38, %v1563_v41 }
 0x164   : > { %v842_v33 = vpop.permute.xlu1 %841  ;;  %v3377_v35 = vpop.eup %2168  ;;  %v1553_v43 = vmul.f32 %v2167_v29, %v3313_v20  ;;  %2174 = vpow2.f32 %v1963_v53  ;;  %v1576_v3 = vand.u32 2147483647, %v3358_v9  ;;  %v1578_v40 = vand.u32 2147483648, %v3358_v9  ;;  %v3950_v53 = vld [vmem:[#allocation11_spill] sm:$0xff] }
 0x165   : > { %2176 = vrcp.f32 %v3365_v42  ;;  %v3392_v50 = vmul.f32 %v1550_v54, %v3945_v5  ;;  %vm1497_vm13 = vweird.f32 %v3340_v19  ;;  %vm1572_vm14 = vweird.f32 %v3358_v9 }
 0x166   : > { %v1554_v60 = vsub.f32 1.0, %v1553_v43  ;;  %v906_v24 = vmul.f32 %v2815_v62, %v842_v33  ;;  %v1470_v4 = vsel %vm3398_vm12, %v3276_v23, %v1466_v27  ;;  %vm1558_vm15 = vweird.f32 %v2167_v29  ;;  %v995_v43 = vpop.permute.xlu2 %994 }
 0x167   : > { %v2171_v28 = vpop.eup %2170  ;;  %vm1472_vm0 = vcmp.eq.f32.partialorder %v1471_v38, 8.507059e+37  ;;  %v1474_v30 = vor.u32 1.1754944e-38, %v1473_v39  ;;  %vm3410_vm1 = vcmp.eq.f32.partialorder %v1576_v3, 8.507059e+37  ;;  %v1579_v45 = vor.u32 1.1754944e-38, %v1578_v40  ;;  %vm1559_vm2 = vmor %vm1557_vm10, %vm1558_vm15  ;;  %v3951_v38 = vld [vmem:[#allocation15_spill] sm:$0xff]  ;;  %v3952_v40 = vld [vmem:[#allocation12_spill] sm:$0xff] }
 0x168   : > { %v1493_v46 = vmul.f32 %v2171_v28, %v3340_v19  ;;  %v1555_v11 = vmul.f32 %v2167_v29, %v1554_v60  ;;  %2178 = vpow2.f32 %v1964_v7  ;;  %v907_v21 = vmul.f32 %v2817_v63, %v842_v33 }
 0x169   : > { %v2173_v57 = vpop.eup %2172  ;;  %v1475_v23 = vsel %vm1472_vm0, %v1474_v30, %v1470_v4  ;;  %v1501_v10 = vand.u32 2147483647, %v3340_v19  ;;  %v938_v51 = vadd.f32 %v906_v24, %v3950_v53  ;;  %v1503_v14 = vand.u32 2147483648, %v3340_v19 }
 0x16a   : > { %v1568_v48 = vmul.f32 %v2173_v57, %v3358_v9  ;;  %v2175_v55 = vpop.eup %2174  ;;  %v1556_v2 = vadd.f32 %v2167_v29, %v1555_v11  ;;  %v1494_v56 = vsub.f32 1.0, %v1493_v46  ;;  %v1478_v41 = vmul.f32 %v3309_v32, %v3245_v16 }
 0x16b   : > { %v3422_v34 = vpop.eup %2176  ;;  %vm1573_vm3 = vweird.f32 %v2173_v57  ;;  %vm1498_vm4 = vweird.f32 %v2171_v28  ;;  %v3426_v27 = vadd.f32 1.0, %v2175_v55  ;;  %v939_v60 = vadd.f32 %v907_v21, %v3952_v40  ;;  %v3957_v40 = vld [vmem:[#allocation21_spill] sm:$0xff] }
 0x16c   : > { %v1569_v1 = vsub.f32 1.0, %v1568_v48  ;;  %v1560_v17 = vsel %vm1559_vm2, %v2167_v29, %v1556_v2  ;;  %v1495_v7 = vmul.f32 %v2171_v28, %v1494_v56  ;;  %vm1502_vm5 = vcmp.eq.f32.partialorder %v1501_v10, 8.507059e+37  ;;  %vm1499_vm6 = vmor %vm1497_vm13, %vm1498_vm4  ;;  %v3954_v56 = vld [vmem:[#allocation16_spill] sm:$0xff] }
 0x16d   : > { %v1010_v54 = vpop.permute.xlu1 %1009  ;;  %v1565_v33 = vsel %vm3384_vm11, %v1564_v13, %v1560_v17  ;;  %v1504_v22 = vor.u32 1.1754944e-38, %v1503_v14  ;;  %v3953_v13 = vld [vmem:[#allocation25_spill] sm:$0xff]  ;;  %v1479_v4 = vsub.f32 1.0, %v1478_v41  ;;  %vm1574_vm7 = vmor %vm1572_vm14, %vm1573_vm3  ;;  %2180 = vrcp.f32 %v3426_v27 }
 0x16e   : > { %v1570_v20 = vmul.f32 %v2173_v57, %v1569_v1  ;;  %v3429_v39 = vadd.f32 %v1010_v54, %v3951_v38  ;;  %v1724_v3 = vmul.f32 %v1565_v33, %v3261_v6  ;;  %v1496_v5 = vadd.f32 %v2171_v28, %v1495_v7  ;;  %v2179_v29 = vpop.eup %2178 }
 0x16f   : > { %v1718_v24 = vmul.f32 %v1475_v23, %v3953_v13  ;;  %v3440_v6 = vadd.f32 %v995_v43, %v938_v51  ;;  %v1480_v21 = vmul.f32 %v3309_v32, %v1479_v4  ;;  %v3449_v2 = vadd.f32 %v995_v43, %v939_v60 }
 0x170   : > { %v1571_v37 = vadd.f32 %v2173_v57, %v1570_v20  ;;  %v1744_v46 = vpack.c.bf16 %v1724_v3, %v3368_v36  ;;  %v1961_v11 = vmul.f32 -1.442695, %v3429_v39  ;;  %v1500_v30 = vsel %vm1499_vm6, %v2171_v28, %v1496_v5 }
 0x171   : > { %v1505_v19 = vsel %vm1502_vm5, %v1504_v22, %v1500_v30  ;;  %v3447_v36 = vadd.f32 1.0, %v2179_v29  ;;  %v1481_v28 = vadd.f32 %v3309_v32, %v1480_v21  ;;  %vm1483_vm8 = vweird.f32 %v3309_v32  ;;  %v3958_v22 = vld [vmem:[#allocation22_spill] sm:$0xff] }
 0x172   : > { %v1575_v48 = vsel %vm1574_vm7, %v2173_v57, %v1571_v37  ;;  %1757 = vmatpush.bf16.msra.mxu0 %v1744_v46  ;;  %v1720_v9 = vmul.f32 %v1505_v19, %v3272_v58  ;;  %v1508_v57 = vmul.f32 %v3422_v34, %v3365_v42  ;;  %v3458_v10 = vadd.f32 %v1010_v54, %v3954_v56  ;;  %v990_v37 = vpop.permute.xlu2 %989  ;;  %v3959_v19 = vld [vmem:[#allocation26_spill] sm:$0xff] }
 0x173   : > { %v1580_v55 = vsel %vm3410_vm1, %v1579_v45, %v1575_v48  ;;  %2182 = vpow2.f32 %v1961_v11  ;;  %v1488_v45 = vand.u32 2147483648, %v3245_v16  ;;  %vm1482_vm9 = vweird.f32 %v3245_v16 }
 0x174   : > { %v1725_v23 = vmul.f32 %v1580_v55, %v3283_v31  ;;  %v1742_v8 = vpack.c.bf16 %v1720_v9, %v1718_v24  ;;  %v1486_v58 = vand.u32 2147483647, %v3245_v16  ;;  %v1509_v31 = vsub.f32 1.0, %v1508_v57  ;;  %vm3470_vm10 = vmor %vm1482_vm9, %vm1483_vm8 }
 0x175   : > { %v1955_v51 = vmul.f32 -1.442695, %v3440_v6  ;;  %v1956_v14 = vmul.f32 -1.442695, %v3449_v2  ;;  %v1485_v16 = vsel %vm3470_vm10, %v3309_v32, %v1481_v28  ;;  %vm1513_vm11 = vweird.f32 %v3422_v34 }
 0x176   : > { %v1745_v1 = vpack.c.bf16 %v1725_v23, %v3392_v50  ;;  %v838_v53 = vpop.permute.xlu1 %837  ;;  %1758 = vmatpush.bf16.msra.mxu0 %v1742_v8  ;;  %v3474_v50 = vpop.eup %2180  ;;  %v1510_v7 = vmul.f32 %v3422_v34, %v1509_v31  ;;  %v1516_v33 = vand.u32 2147483647, %v3365_v42  ;;  %2184 = vrcp.f32 %v3447_v36 }
 0x177   : > { %v904_v41 = vmul.f32 %v2815_v62, %v838_v53  ;;  %v905_v17 = vmul.f32 %v2817_v63, %v838_v53  ;;  %v1962_v20 = vmul.f32 -1.442695, %v3458_v10  ;;  %v1489_v43 = vor.u32 1.1754944e-38, %v1488_v45 }
 0x178   : > { %1770 = vmatpush.bf16.msra.mxu1 %v1745_v1  ;;  %v1518_v38 = vand.u32 2147483648, %v3365_v42  ;;  %vm1487_vm12 = vcmp.eq.f32.partialorder %v1486_v58, 8.507059e+37  ;;  %v1511_v3 = vadd.f32 %v3422_v34, %v1510_v7  ;;  %vm1512_vm13 = vweird.f32 %v3365_v42  ;;  %v3960_v58 = vld [vmem:[#allocation13_spill] sm:$0xff] }
 0x179   : > { %v936_v32 = vadd.f32 %v904_v41, %v3957_v40  ;;  %v2183_v60 = vpop.eup %2182  ;;  %v1490_v5 = vsel %vm1487_vm12, %v1489_v43, %v1485_v16  ;;  %vm1514_vm14 = vmor %vm1512_vm13, %vm1513_vm11  ;;  %v937_v13 = vadd.f32 %v905_v17, %v3958_v22  ;;  %v1403_v24 = vmul.f32 %v3474_v50, %v3426_v27 }
 0x17a   : > { %v1519_v29 = vor.u32 1.1754944e-38, %v1518_v38  ;;  %2186 = vpow2.f32 %v1955_v51  ;;  %v1515_v4 = vsel %vm1514_vm14, %v3422_v34, %v1511_v3  ;;  %vm1517_vm15 = vcmp.eq.f32.partialorder %v1516_v33, 8.507059e+37  ;;  %v3965_v51 = vld [vmem:[#allocation20_spill] sm:$0xff] }
 0x17b   : > { %v3492_v46 = vadd.f32 %v990_v37, %v936_v32  ;;  %2188 = vpow2.f32 %v1962_v20  ;;  %v3494_v11 = vadd.f32 %v990_v37, %v937_v13  ;;  %v1404_v30 = vsub.f32 1.0, %v1403_v24 }
 0x17c   : > { %v1520_v42 = vsel %vm1517_vm15, %v1519_v29, %v1515_v4  ;;  %v3496_v48 = vadd.f32 1.0, %v2183_v60  ;;  %v1719_v21 = vmul.f32 %v1490_v5, %v3959_v19  ;;  %v3501_v23 = vpop.eup %2184  ;;  %vm1408_vm0 = vweird.f32 %v3474_v50  ;;  %v3963_v4 = vld [vmem:[#allocation14_spill] sm:$0xff] }
 0x17d   : > { %v1721_v55 = vmul.f32 %v1520_v42, %v3274_v52  ;;  %v1953_v9 = vmul.f32 -1.442695, %v3492_v46  ;;  %v1954_v34 = vmul.f32 -1.442695, %v3494_v11  ;;  %v1405_v28 = vmul.f32 %v3474_v50, %v1404_v30 }
 0x17e   : > { %v1433_v57 = vmul.f32 %v3323_v25, %v3265_v12  ;;  %vm1407_vm1 = vweird.f32 %v3426_v27  ;;  %v1413_v8 = vand.u32 2147483648, %v3426_v27  ;;  %v1411_v45 = vand.u32 2147483647, %v3426_v27 }
 0x17f   : > { %v1743_v56 = vpack.c.bf16 %v1721_v55, %v1719_v21  ;;  %2190 = vpow2.f32 %v1953_v9  ;;  %v1406_v52 = vadd.f32 %v3474_v50, %v1405_v28  ;;  %v942_v31 = vadd.f32 %v3293_v61, %v3960_v58  ;;  %vm3514_vm2 = vmor %vm1407_vm1, %vm1408_vm0  ;;  %v1005_v28 = vpop.permute.xlu0 %1004 }
 0x180   : > { %2192 = vpow2.f32 %v1954_v34  ;;  %v1434_v1 = vsub.f32 1.0, %v1433_v57  ;;  %v2187_v53 = vpop.eup %2186  ;;  %v1443_v41 = vand.u32 2147483648, %v3265_v12  ;;  %v1418_v17 = vmul.f32 %v3501_v23, %v3447_v36 }
 0x181   : > { %2194 = vpow2.f32 %v1956_v14  ;;  %1771 = vmatpush.bf16.msra.mxu1 %v1743_v56  ;;  %v2189_v54 = vpop.eup %2188  ;;  %v1410_v27 = vsel %vm3514_vm2, %v3474_v50, %v1406_v52  ;;  %vm1438_vm3 = vweird.f32 %v3323_v25  ;;  %v1441_v61 = vand.u32 2147483647, %v3265_v12  ;;  %v985_v52 = vpop.permute.xlu1 %984 }
 0x182   : > { %v1435_v16 = vmul.f32 %v3323_v25, %v1434_v1  ;;  %2196 = vrcp.f32 %v3496_v48  ;;  %v1414_v14 = vor.u32 1.1754944e-38, %v1413_v8  ;;  %vm1437_vm4 = vweird.f32 %v3265_v12 }
 0x183   : > { %v1419_v7 = vsub.f32 1.0, %v1418_v17  ;;  %vm1412_vm5 = vcmp.eq.f32.partialorder %v1411_v45, 8.507059e+37  ;;  %vm1423_vm6 = vweird.f32 %v3501_v23  ;;  %v1426_v20 = vand.u32 2147483647, %v3447_v36  ;;  %vm1439_vm7 = vmor %vm1437_vm4, %vm1438_vm3  ;;  %v3964_v45 = vld [vmem:[#allocation19_spill] sm:$0xff] }
 0x184   : > { %v1436_v33 = vadd.f32 %v3323_v25, %v1435_v16  ;;  %v1415_v43 = vsel %vm1412_vm5, %v1414_v14, %v1410_v27  ;;  %v1444_v38 = vor.u32 1.1754944e-38, %v1443_v41  ;;  %v1448_v40 = vmul.f32 %v3377_v35, %v3299_v49 }
 0x185   : > { %v2191_v50 = vpop.eup %2190  ;;  %v1420_v3 = vmul.f32 %v3501_v23, %v1419_v7  ;;  %vm1442_vm8 = vcmp.eq.f32.partialorder %v1441_v61, 8.507059e+37  ;;  %v1428_v5 = vand.u32 2147483648, %v3447_v36  ;;  %v943_v42 = vadd.f32 %v3337_v26, %v3963_v4  ;;  %v3967_v4 = vld [vmem:[#allocation18_spill] sm:$0xff] }
 0x186   : > { %v2193_v32 = vpop.eup %2192  ;;  %v3535_v60 = vadd.f32 1.0, %v2191_v50  ;;  %v1440_v12 = vsel %vm1439_vm7, %v3323_v25, %v1436_v33  ;;  %v1449_v24 = vsub.f32 1.0, %v1448_v40  ;;  %v1714_v30 = vmul.f32 %v1415_v43, %v3329_v59 }
 0x187   : > { %v2195_v29 = vpop.eup %2194  ;;  %v3539_v37 = vadd.f32 1.0, %v2193_v32  ;;  %v1445_v22 = vsel %vm1442_vm8, %v1444_v38, %v1440_v12  ;;  %v1421_v13 = vadd.f32 %v3501_v23, %v1420_v3  ;;  %vm1422_vm9 = vweird.f32 %v3447_v36  ;;  %v3966_v12 = vld [vmem:[#allocation17_spill] sm:$0xff] }
 0x188   : > { %2198 = vrcp.f32 %v3535_v60  ;;  %v3547_v25 = vpop.eup %2196  ;;  %v902_v19 = vmul.f32 %v2815_v62, %v3382_v47  ;;  %v903_v21 = vmul.f32 %v2817_v63, %v3382_v47  ;;  %v3553_v55 = vadd.f32 1.0, %v2189_v54  ;;  %vm1424_vm10 = vmor %vm1422_vm9, %vm1423_vm6 }
 0x189   : > { %2200 = vrcp.f32 %v3539_v37  ;;  %v1716_v26 = vmul.f32 %v1445_v22, %v3174_v44  ;;  %v1425_v59 = vsel %vm1424_vm10, %v3501_v23, %v1421_v13  ;;  %v1429_v36 = vor.u32 1.1754944e-38, %v1428_v5 }
 0x18a   : > { %v1456_v9 = vand.u32 2147483647, %v3299_v49  ;;  %v908_v34 = vmul.f32 %v2815_v62, %v3311_v18  ;;  %vm1427_vm11 = vcmp.eq.f32.partialorder %v1426_v20, 8.507059e+37  ;;  %v1450_v47 = vmul.f32 %v3377_v35, %v1449_v24 }
 0x18b   : > { %vm1453_vm12 = vweird.f32 %v3377_v35  ;;  %v3565_v57 = vadd.f32 1.0, %v2187_v53  ;;  %v1740_v56 = vpack.c.bf16 %v1716_v26, %v1714_v30  ;;  %v1430_v8 = vsel %vm1427_vm11, %v1429_v36, %v1425_v59 }
 0x18c   : > { %v1458_v44 = vand.u32 2147483648, %v3299_v49  ;;  %v1451_v23 = vadd.f32 %v3377_v35, %v1450_v47  ;;  %vm1452_vm13 = vweird.f32 %v3299_v49  ;;  %v934_v1 = vadd.f32 %v902_v19, %v3964_v45 }
 0x18d   : > { %v3571_v62 = vadd.f32 %v1005_v28, %v942_v31  ;;  %2202 = vrcp.f32 %v3553_v55  ;;  %1759 = vmatpush.bf16.msra.mxu0 %v1740_v56  ;;  %vm1454_vm14 = vmor %vm1452_vm13, %vm1453_vm12  ;;  %vm1457_vm15 = vcmp.eq.f32.partialorder %v1456_v9, 8.507059e+37  ;;  %v935_v41 = vadd.f32 %v903_v21, %v3965_v51 }
 0x18e   : > { %v3573_v58 = vpop.eup %2198  ;;  %v1459_v53 = vor.u32 1.1754944e-38, %v1458_v44  ;;  %v1455_v49 = vsel %vm1454_vm14, %v3377_v35, %v1451_v23  ;;  %v1715_v31 = vmul.f32 %v1430_v8, %v3355_v15  ;;  %v3583_v27 = vadd.f32 %v985_v52, %v934_v1 }
 0x18f   : > { %v3577_v17 = vpop.eup %2200  ;;  %v1253_v54 = vmul.f32 %v3573_v58, %v3535_v60  ;;  %v3585_v16 = vadd.f32 1.0, %v2195_v29  ;;  %2204 = vrcp.f32 %v3565_v57  ;;  %v3588_v14 = vadd.f32 %v985_v52, %v935_v41  ;;  %v1000_v52 = vpop.permute.xlu0 %999 }
 0x190   : > { %v1460_v61 = vsel %vm1457_vm15, %v1459_v53, %v1455_v49  ;;  %v1951_v33 = vmul.f32 -1.442695, %v3583_v27  ;;  %v1959_v20 = vmul.f32 -1.442695, %v3571_v62  ;;  %v3593_v50 = vadd.f32 %v1005_v28, %v943_v42 }
 0x191   : > { %v1717_v7 = vmul.f32 %v1460_v61, %v3194_v0  ;;  %v1254_v35 = vsub.f32 1.0, %v1253_v54  ;;  %v1268_v15 = vmul.f32 %v3577_v17, %v3539_v37  ;;  %v1952_v43 = vmul.f32 -1.442695, %v3588_v14 }
 0x192   : > { %v1373_v38 = vmul.f32 %v3547_v25, %v3496_v48  ;;  %v909_v3 = vmul.f32 %v2817_v63, %v3311_v18  ;;  %2206 = vpow2.f32 %v1951_v33  ;;  %v940_v5 = vadd.f32 %v908_v34, %v3966_v12 }
 0x193   : > { %v1741_v40 = vpack.c.bf16 %v1717_v7, %v1715_v31  ;;  %v3602_v0 = vpop.eup %2202  ;;  %2208 = vpow2.f32 %v1952_v43  ;;  %v1261_v29 = vand.u32 2147483647, %v3535_v60  ;;  %v1960_v22 = vmul.f32 -1.442695, %v3593_v50 }
 0x194   : > { %v1374_v32 = vsub.f32 1.0, %v1373_v38  ;;  %2210 = vpow2.f32 %v1959_v20  ;;  %v1255_v63 = vmul.f32 %v3573_v58, %v1254_v35  ;;  %v1269_v18 = vsub.f32 1.0, %v1268_v15 }
 0x195   : > { %1772 = vmatpush.bf16.msra.mxu1 %v1741_v40  ;;  %v3607_v13 = vpop.eup %2204  ;;  %2212 = vrcp.f32 %v3585_v16  ;;  %v941_v42 = vadd.f32 %v909_v3, %v3967_v4  ;;  %vm1257_vm0 = vweird.f32 %v3535_v60  ;;  %v1263_v30 = vand.u32 2147483648, %v3535_v60 }
 0x196   : > { %v1375_v24 = vmul.f32 %v3547_v25, %v1374_v32  ;;  %2214 = vpow2.f32 %v1960_v22  ;;  %vm1272_vm1 = vweird.f32 %v3539_v37  ;;  %v1276_v19 = vand.u32 2147483647, %v3539_v37 }
 0x197   : > { %v1278_v21 = vand.u32 2147483648, %v3539_v37  ;;  %v1388_v26 = vmul.f32 %v3602_v0, %v3553_v55  ;;  %vm1258_vm2 = vweird.f32 %v3573_v58  ;;  %vm3621_vm3 = vcmp.eq.f32.partialorder %v1261_v29, 8.507059e+37 }
 0x198   : > { %v2207_v59 = vpop.eup %2206  ;;  %v1376_v9 = vadd.f32 %v3547_v25, %v1375_v24  ;;  %vm1378_vm4 = vweird.f32 %v3547_v25  ;;  %v1256_v47 = vadd.f32 %v3573_v58, %v1255_v63  ;;  %v1270_v28 = vmul.f32 %v3577_v17, %v1269_v18  ;;  %vm3653_vm7 = vmor %vm1257_vm0, %vm1258_vm2 }
 0x199   : > { %v2209_v34 = vpop.eup %2208  ;;  %v3629_v56 = vadd.f32 1.0, %v2207_v59  ;;  %v1383_v8 = vand.u32 2147483648, %v3496_v48  ;;  %v1264_v23 = vor.u32 1.1754944e-38, %v1263_v30  ;;  %vm1377_vm5 = vweird.f32 %v3496_v48 }
 0x19a   : > { %v2211_v44 = vpop.eup %2210  ;;  %v3632_v45 = vadd.f32 1.0, %v2209_v34  ;;  %v1381_v1 = vand.u32 2147483647, %v3496_v48  ;;  %v3638_v51 = vor.u32 1.1754944e-38, %v1278_v21  ;;  %vm3643_vm6 = vmor %vm1377_vm5, %vm1378_vm4  ;;  %v1389_v54 = vsub.f32 1.0, %v1388_v26 }
 0x19b   : > { %v3636_v53 = vpop.eup %2212  ;;  %2216 = vrcp.f32 %v3629_v56  ;;  %v3647_v49 = vadd.f32 %v1000_v52, %v940_v5  ;;  %vm1273_vm8 = vweird.f32 %v3577_v17  ;;  %v1380_v61 = vsel %vm3643_vm6, %v3547_v25, %v1376_v9 }
 0x19c   : > { %v2215_v31 = vpop.eup %2214  ;;  %2218 = vrcp.f32 %v3632_v45  ;;  %v3662_v7 = vadd.f32 %v1000_v52, %v941_v42  ;;  %v1260_v33 = vsel %vm3653_vm7, %v3573_v58, %v1256_v47  ;;  %v3668_v60 = vadd.f32 %v3577_v17, %v1270_v28  ;;  %vm3687_vm10 = vmor %vm1272_vm1, %vm1273_vm8 }
 0x19d   : > { %v3670_v20 = vadd.f32 1.0, %v2211_v44  ;;  %v1384_v35 = vor.u32 1.1754944e-38, %v1383_v8  ;;  %v1233_v15 = vand.u32 2147483648, %v3629_v56  ;;  %vm1382_vm9 = vcmp.eq.f32.partialorder %v1381_v1, 8.507059e+37 }
 0x19e   : > { %v3673_v43 = vadd.f32 1.0, %v2215_v31  ;;  %v1396_v38 = vand.u32 2147483647, %v3553_v55  ;;  %v1231_v25 = vand.u32 2147483647, %v3629_v56  ;;  %v1390_v58 = vmul.f32 %v3602_v0, %v1389_v54 }
 0x19f   : > { %2220 = vrcp.f32 %v3670_v20  ;;  %v1385_v3 = vsel %vm1382_vm9, %v1384_v35, %v1380_v61  ;;  %v3681_v40 = vsel %vm3621_vm3, %v1264_v23, %v1260_v33  ;;  %v1248_v12 = vand.u32 2147483648, %v3632_v45 }
 0x1a0   : > { %2222 = vrcp.f32 %v3673_v43  ;;  %vm1392_vm11 = vweird.f32 %v3553_v55  ;;  %v1275_v29 = vsel %vm3687_vm10, %v3577_v17, %v3668_v60  ;;  %vm1227_vm12 = vweird.f32 %v3629_v56 }
 0x1a1   : > { %v2217_v5 = vpop.eup %2216  ;;  %vm1393_vm13 = vweird.f32 %v3602_v0  ;;  %v1398_v22 = vand.u32 2147483648, %v3553_v55  ;;  %v1234_v24 = vor.u32 1.1754944e-38, %v1233_v15  ;;  %vm1242_vm14 = vweird.f32 %v3632_v45 }
 0x1a2   : > { %v3701_v63 = vpop.eup %2218  ;;  %v1223_v18 = vmul.f32 %v2217_v5, %v3629_v56  ;;  %v1246_v4 = vand.u32 2147483647, %v3632_v45  ;;  %v3707_v42 = vmul.f32 %v1385_v3, %v3429_v39  ;;  %vm3709_vm15 = vcmp.eq.f32.partialorder %v1396_v38, 8.507059e+37  ;;  %vm3738_vm5 = vmor %vm1392_vm11, %vm1393_vm13 }
 0x1a3   : > { %vm3713_vm0 = vcmp.eq.f32.partialorder %v1231_v25, 8.507059e+37  ;;  %v1238_v26 = vmul.f32 %v3701_v63, %v3632_v45  ;;  %v1351_v59 = vand.u32 2147483647, %v3670_v20  ;;  %v1391_v36 = vadd.f32 %v3602_v0, %v1390_v58 }
 0x1a4   : > { %v1957_v9 = vmul.f32 -1.442695, %v3647_v49  ;;  %v1224_v34 = vsub.f32 1.0, %v1223_v18  ;;  %v1249_v39 = vor.u32 1.1754944e-38, %v1248_v12  ;;  %vm1347_vm1 = vweird.f32 %v3670_v20 }
 0x1a5   : > { %v1353_v47 = vand.u32 2147483648, %v3670_v20  ;;  %v2221_v28 = vpop.eup %2220  ;;  %v1239_v8 = vsub.f32 1.0, %v1238_v26  ;;  %vm1362_vm2 = vweird.f32 %v3673_v43  ;;  %v1366_v44 = vand.u32 2147483647, %v3673_v43 }
 0x1a6   : > { %2224 = vpow2.f32 %v1957_v9  ;;  %v1283_v52 = vmul.f32 %v3607_v13, %v3565_v57  ;;  %v2223_v23 = vpop.eup %2222  ;;  %v1225_v1 = vmul.f32 %v2217_v5, %v1224_v34  ;;  %vm1228_vm3 = vweird.f32 %v2217_v5 }
 0x1a7   : > { %vm3728_vm4 = vcmp.eq.f32.partialorder %v1246_v4, 8.507059e+37  ;;  %v1343_v54 = vmul.f32 %v2221_v28, %v3670_v20  ;;  %v1368_v31 = vand.u32 2147483648, %v3673_v43  ;;  %vm3744_vm6 = vcmp.eq.f32.partialorder %v1276_v19, 8.507059e+37  ;;  %vm3760_vm9 = vmor %vm1227_vm12, %vm1228_vm3 }
 0x1a8   : > { %v1240_v33 = vmul.f32 %v3701_v63, %v1239_v8  ;;  %vm3749_vm7 = vcmp.eq.f32.partialorder %v1351_v59, 8.507059e+37  ;;  %v1358_v15 = vmul.f32 %v2223_v23, %v3673_v43  ;;  %v1395_v55 = vsel %vm3738_vm5, %v3602_v0, %v1391_v36 }
 0x1a9   : > { %v1226_v38 = vadd.f32 %v2217_v5, %v1225_v1  ;;  %vm1243_vm8 = vweird.f32 %v3701_v63  ;;  %v1344_v37 = vsub.f32 1.0, %v1343_v54  ;;  %v1399_v19 = vor.u32 1.1754944e-38, %v1398_v22 }
 0x1aa   : > { %v1241_v3 = vadd.f32 %v3701_v63, %v1240_v33  ;;  %v1359_v58 = vsub.f32 1.0, %v1358_v15  ;;  %v1284_v12 = vsub.f32 1.0, %v1283_v52  ;;  %v1958_v18 = vmul.f32 -1.442695, %v3662_v7  ;;  %vm3770_vm13 = vmor %vm1242_vm14, %vm1243_vm8 }
 0x1ab   : > { %v1230_v0 = vsel %vm3760_vm9, %v2217_v5, %v1226_v38  ;;  %v1345_v4 = vmul.f32 %v2221_v28, %v1344_v37  ;;  %vm1348_vm11 = vweird.f32 %v2221_v28  ;;  %v1354_v26 = vor.u32 1.1754944e-38, %v1353_v47 }
 0x1ac   : > { %v2225_v59 = vpop.eup %2224  ;;  %v1360_v22 = vmul.f32 %v2223_v23, %v1359_v58  ;;  %vm1363_vm12 = vweird.f32 %v2223_v23  ;;  %v1400_v36 = vsel %vm3709_vm15, %v1399_v19, %v1395_v55  ;;  %2226 = vpow2.f32 %v1958_v18  ;;  %vm1349_vm14 = vmor %vm1347_vm1, %vm1348_vm11 }
 0x1ad   : > { %v1235_v9 = vsel %vm3713_vm0, %v1234_v24, %v1230_v0  ;;  %v1245_v5 = vsel %vm3770_vm13, %v3701_v63, %v1241_v3  ;;  %v1346_v34 = vadd.f32 %v2221_v28, %v1345_v4  ;;  %v3781_v47 = vadd.f32 1.0, %v2225_v59  ;;  %vm1364_vm15 = vmor %vm1362_vm2, %vm1363_vm12 }
 0x1ae   : > { %v1361_v45 = vadd.f32 %v2223_v23, %v1360_v22  ;;  %vm1367_vm3 = vcmp.eq.f32.partialorder %v1366_v44, 8.507059e+37  ;;  %v1285_v8 = vmul.f32 %v3607_v13, %v1284_v12  ;;  %v1298_v30 = vmul.f32 %v3636_v53, %v3585_v16 }
 0x1af   : > { %v1350_v52 = vsel %vm1349_vm14, %v2221_v28, %v1346_v34  ;;  %v1369_v24 = vor.u32 1.1754944e-38, %v1368_v31  ;;  %v1713_v63 = vmul.f32 %v1400_v36, %v3458_v10  ;;  %2228 = vrcp.f32 %v3781_v47 }
 0x1b0   : > { %v1250_v20 = vsel %vm3728_vm4, %v1249_v39, %v1245_v5  ;;  %v3795_v21 = vmul.f32 %v1235_v9, %v3583_v27  ;;  %v1355_v44 = vsel %vm3749_vm7, %v1354_v26, %v1350_v52  ;;  %v1365_v1 = vsel %vm1364_vm15, %v2223_v23, %v1361_v45 }
 0x1b1   : > { %v1280_v10 = vsel %vm3744_vm6, %v3638_v51, %v1275_v29  ;;  %v3809_v43 = vmul.f32 %v3681_v40, %v3492_v46  ;;  %v1710_v27 = vmul.f32 %v1355_v44, %v3571_v62  ;;  %v1370_v39 = vsel %vm1367_vm3, %v1369_v24, %v1365_v1 }
 0x1b2   : > { %v2227_v28 = vpop.eup %2226  ;;  %v1711_v41 = vmul.f32 %v1370_v39, %v3593_v50  ;;  %v1286_v23 = vadd.f32 %v3607_v13, %v1285_v8  ;;  %vm1288_vm0 = vweird.f32 %v3607_v13  ;;  %v1299_v32 = vsub.f32 1.0, %v1298_v30  ;;  %v419_v30 = vld [vmem:[%s3894_s6] sm:$0x3] }
 0x1b3   : > { %v3816_v17 = vmul.f32 %v1250_v20, %v3588_v14  ;;  %v1738_v51 = vpack.c.bf16 %v3707_v42, %v1710_v27  ;;  %v1293_v60 = vand.u32 2147483648, %v3565_v57  ;;  %v1197_v46 = vadd.f32 1.0, %v2227_v28 }
 0x1b4   : > { %v1739_v40 = vpack.c.bf16 %v1713_v63, %v1711_v41  ;;  %vm1287_vm10 = vweird.f32 %v3565_v57  ;;  %v1291_v62 = vand.u32 2147483647, %v3565_v57  ;;  %v1734_v50 = vpack.c.bf16 %v3809_v43, %v3795_v21 }
 0x1b5   : > { %v2229_v29 = vpop.eup %2228  ;;  %v1705_v54 = vmul.f32 %v1280_v10, %v3494_v11  ;;  %1760 = vmatpush.bf16.msra.mxu0 %v1738_v51  ;;  %vm1289_vm1 = vmor %vm1287_vm10, %vm1288_vm0  ;;  %2230 = vrcp.f32 %v1197_v46  ;;  %v1300_v31 = vmul.f32 %v3636_v53, %v1299_v32  ;;  %v1294_v48 = vor.u32 1.1754944e-38, %v1293_v60 }
 0x1b6   : > { %1773 = vmatpush.bf16.msra.mxu1 %v1739_v40  ;;  %v1290_v14 = vsel %vm1289_vm1, %v3607_v13, %v1286_v23  ;;  %v1313_v42 = vmul.f32 %v2229_v29, %v3781_v47  ;;  %vm1292_vm2 = vcmp.eq.f32.partialorder %v1291_v62, 8.507059e+37  ;;  %v1323_v35 = vand.u32 2147483648, %v3781_v47 }
 0x1b7   : > { %v1735_v61 = vpack.c.bf16 %v1705_v54, %v3816_v17  ;;  %v1295_v33 = vsel %vm1292_vm2, %v1294_v48, %v1290_v14  ;;  %vm1303_vm4 = vweird.f32 %v3636_v53  ;;  %vm1318_vm5 = vweird.f32 %v2229_v29 }
 0x1b8   : > { %v1314_v57 = vsub.f32 1.0, %v1313_v42  ;;  %v1321_v15 = vand.u32 2147483647, %v3781_v47  ;;  %v1301_v13 = vadd.f32 %v3636_v53, %v1300_v31  ;;  %vm1302_vm6 = vweird.f32 %v3585_v16 }
 0x1b9   : > { %v1308_v38 = vand.u32 2147483648, %v3585_v16  ;;  %vm1317_vm7 = vweird.f32 %v3781_v47  ;;  %vm3836_vm8 = vmor %vm1302_vm6, %vm1303_vm4  ;;  %v1306_v25 = vand.u32 2147483647, %v3585_v16  ;;  %v1324_v58 = vor.u32 1.1754944e-38, %v1323_v35 }
 0x1ba   : > { %v1315_v11 = vmul.f32 %v2229_v29, %v1314_v57  ;;  %vm1319_vm9 = vmor %vm1317_vm7, %vm1318_vm5  ;;  %v1706_v12 = vmul.f32 %v1295_v33, %v3440_v6  ;;  %vm1322_vm11 = vcmp.eq.f32.partialorder %v1321_v15, 8.507059e+37  ;;  %v1305_v0 = vsel %vm3836_vm8, %v3636_v53, %v1301_v13 }
 0x1bb   : > { %v2231_v55 = vpop.eup %2230  ;;  %v1309_v59 = vor.u32 1.1754944e-38, %v1308_v38  ;;  %v1336_v56 = vand.u32 2147483647, %v1197_v46  ;;  %v1338_v22 = vand.u32 2147483648, %v1197_v46  ;;  %vm1307_vm13 = vcmp.eq.f32.partialorder %v1306_v25, 8.507059e+37 }
 0x1bc   : > { %v1316_v37 = vadd.f32 %v2229_v29, %v1315_v11  ;;  %v1328_v3 = vmul.f32 %v2231_v55, %v1197_v46  ;;  %vm1333_vm12 = vweird.f32 %v2231_v55  ;;  %vm1332_vm14 = vweird.f32 %v1197_v46 }
 0x1bd   : > { %v1310_v9 = vsel %vm1307_vm13, %v1309_v59, %v1305_v0  ;;  %vm1334_vm3 = vmor %vm1332_vm14, %vm1333_vm12  ;;  %v1339_v6 = vor.u32 1.1754944e-38, %v1338_v22  ;;  %vm1337_vm15 = vcmp.eq.f32.partialorder %v1336_v56, 8.507059e+37  ;;  %vm1784_vm0 = vcmask 1043456  }
 0x1be   : > { %v1320_v18 = vsel %vm1319_vm9, %v2229_v29, %v1316_v37  ;;  %v1329_v4 = vsub.f32 1.0, %v1328_v3  ;;  %v1707_v47 = vmul.f32 %v1310_v9, %v3449_v2  ;;  %v1753_v2 = vpop.permute.xlu0 %1752 }
 0x1bf   : > { %v1325_v26 = vsel %vm1322_vm11, %v1324_v58, %v1320_v18 }
 0x1c0   : > { %v1708_v36 = vmul.f32 %v1325_v26, %v3647_v49  ;;  %v1330_v16 = vmul.f32 %v2231_v55, %v1329_v4 }
 0x1c2   : > { %v1736_v5 = vpack.c.bf16 %v1708_v36, %v1706_v12  ;;  %v1331_v34 = vadd.f32 %v2231_v55, %v1330_v16 }
 0x1c4   : > { %1761 = vmatpush.bf16.msra.mxu0 %v1736_v5  ;;  %v1335_v53 = vsel %vm1334_vm3, %v2231_v55, %v1331_v34 }
 0x1c5   : > { %v1340_v45 = vsel %vm1337_vm15, %v1339_v6, %v1335_v53 }
 0x1c6   : > { %v1709_v8 = vmul.f32 %v1340_v45, %v3662_v7 }
 0x1c8   : > { %v1737_v49 = vpack.c.bf16 %v1709_v8, %v1707_v47  ;;  %1762 = vmatpush.bf16.msra.mxu0 %v1734_v50 }
 0x1ca   : > { %1774 = vmatpush.bf16.msra.mxu1 %v1737_v49 }
 0x1cb   : > { %1763 = vmatmul.bf16.vlgmr.msra.gmra.mxu0 %v419_v30 }
 0x1ce   : > { %1775 = vmatpush.bf16.msra.mxu1 %v1735_v61 }
 0x1d1   : > { %1776 = vmatmul.bf16.vlgmr.msra.gmra.mxu1 %v419_v30 }
 0x248   : > { %v1764_v52 = vpop.f32.mrf.mxu0 }
 0x249   : > { %v1765_v20 = vadd.f32 %v1764_v52, %v1753_v2 }
 0x24e   : > { %v1777_v7 = vpop.f32.mrf.mxu1 }
 0x24f   : > { %v1778_v24 = vadd.f32 %v1777_v7, %v1753_v2 }
 0x250   : > { %v1766_v63 = vpop.f32.mrf.mxu0 }
 0x251   : > { %v1783_v21 = vrot.slane %v1778_v24, 4 }
 0x253   : > { %v1785_v44 = vsel %vm1784_vm0, %v1765_v20, %v1783_v21 }
 0x254   : > { %1787 = vst [vmem:[%s391_s25] sm:$0xff] %v1785_v44 }
 0x255   : > { %2289 = shalt.err (!%p2286_p9)
}
 0x256   : > { %2000 = dma.vmem_to_hbm [thread:$0]  (%p2441_p4), %s1805_s24, 128, %s1807_s26, %s1789_s30   ;;  %v1779_v1 = vpop.f32.mrf.mxu1 }
 0x257 PF: > { %p2017_p10 = scmp.ge.s32.totalorder %s2348_s10, 2  ;;  %s1818_s16 = sand.u32 1, %s2328_s27  }
 0x258   : > { %s1819_s23 = scalar_lea.sflag [#allocation3], %s1818_s16 }
 0x259   : > { %p2010_p11 = pnand %p2017_p10, %p2448_p8 }
 0x25b   : > { %p2011_p12 = pneg %p2010_p11 }
 0x25d   : > { %2323 = dma.done.wait (%p2011_p12), %s1819_s23, 128  }
 0x25e   : > { %2325 = vsyncadd (%p2011_p12), %s1819_s23, 4294967168  ;;  %s23_s10 = sadd.s32 1, %s2348_s10   ;;  %s3994_s27 = smov %s2332_s28 }
 0x25f   : > { %p20_p13 = scmp.ge.s32.totalorder %s23_s10, 4   ;;  %s3995_s28 = smov %s2336_s29 }
 0x260   : > { %s3996_s29 = smov %s2454_s18  ;;  %s3997_s30 = smov %s2344_s9 }
 0x261   : > { %s3998_s9 = smov %s4000_s13  ;;  %22 = sbr.rel (!%p20_p13) target bundleno = 6 (0x6), region = 102 }
 0x266   :  { %1825 = vsyncpa [#allocation3], 1 }
 0x267   :  { %1827 = vsyncpa [#allocation3 + $0x1], 1 }
 0x268   :  { %1828 = vsyncpa [#allocation4], 1 }
 0x269   :  { %1830 = vsyncpa [#allocation4 + $0x1], 1 }
 0x26a   :  { %1831 = vsyncpa [#allocation6], 1 }

</bundles_post_ra>
